<compile_context>
chip_gen: v7x
topology: tpu7x:2x2x1
jax: 0.10.0
libtpu: 0.0.40
codegen_flags: <defaults>
</compile_context>

<pallas_src>
import jax
import jax.numpy as jnp
from jax import lax
from jax.experimental import pallas as pl
from jax.experimental.pallas import tpu as pltpu

SOIL_K1 = 4    # conv1 out channels
SOIL_K2 = 8    # conv2 out channels
LANES = 128    # batch elements per lane group

# Packed-parameter layout (flat float32 SMEM array).
_W1_OFF = 0                                   # (4,1,2) -> 8
_B1_OFF = _W1_OFF + SOIL_K1 * 2               # 8
_W2_OFF = _B1_OFF + SOIL_K1                   # 12, (8,4,2) -> 64 (pre-scaled by 0.5)
_B2_OFF = _W2_OFF + SOIL_K2 * SOIL_K1 * 2     # 76
_WFC_OFF = _B2_OFF + SOIL_K2                  # 84
_BFC_OFF = _WFC_OFF + 4                       # 88
_P_LEN = _BFC_OFF + 1                         # 89


def soil_h0_kernel(p_ref, x_ref, out_ref):
    # x_ref:   (11, TILE, 128)  -- feature, chunk-row, lane-batch
    # out_ref: (9,  TILE, 128)
    # p_ref:   (89,) float32 in SMEM

    # ---- hoist every scalar read (and its implicit splat) out of the loops ----
    w1 = [[p_ref[_W1_OFF + c * 2 + k] for k in range(2)] for c in range(SOIL_K1)]
    b1 = [p_ref[_B1_OFF + c] for c in range(SOIL_K1)]
    w2 = [[[p_ref[_W2_OFF + o * (SOIL_K1 * 2) + c * 2 + k] for k in range(2)]
           for c in range(SOIL_K1)] for o in range(SOIL_K2)]
    b2 = [p_ref[_B2_OFF + o] for o in range(SOIL_K2)]
    wfc = [p_ref[_WFC_OFF + j] for j in range(4)]
    bfc = p_ref[_BFC_OFF]

    # ---- fc branch: features (0, 8, 9, 10) -> Linear(4, 1), tree-shaped sum ----
    fc_out = ((wfc[0] * x_ref[0] + wfc[1] * x_ref[8])
              + (wfc[2] * x_ref[9] + wfc[3] * x_ref[10] + bfc))   # (TILE, 128)
    out_ref[0] = fc_out                                           # lane-dense store

    # ---- clay branch: features 1..7 (sequence length 7) ----
    clay = [x_ref[1 + t] for t in range(7)]                       # 7 x (TILE, 128)

    # conv1(1->4, k=2, s=1) + tanh -> length 6
    o1 = [[jnp.tanh(w1[c][0] * clay[t] + w1[c][1] * clay[t + 1] + b1[c])
           for t in range(6)]
          for c in range(SOIL_K1)]                                # [4][6] x (TILE, 128)

    # avg1(k=2, s=2): the 0.5 factor is folded into w2 (wrapper pre-scales).
    p1 = [[o1[c][2 * t] + o1[c][2 * t + 1] for t in range(3)]
          for c in range(SOIL_K1)]                                # [4][3] x (TILE, 128)

    # conv2(4->8, k=2, s=1) with pre-scaled weights + tanh (length 2),
    # then avg2(k=2, s=1) -> length 1.  Store each channel immediately.
    for o in range(SOIL_K2):
        o2 = []
        for t in range(2):
            terms = [w2[o][c][0] * p1[c][t] + w2[o][c][1] * p1[c][t + 1]
                     for c in range(SOIL_K1)]
            acc = (terms[0] + terms[1]) + (terms[2] + terms[3]) + b2[o]
            o2.append(jnp.tanh(acc))
        out_ref[1 + o] = 0.5 * (o2[0] + o2[1])                    # lane-dense store


def _pack_params(params):
    w1, b1, w2, b2, wfc, bfc = params
    return jnp.concatenate([
        w1.reshape(-1).astype(jnp.float32),
        b1.reshape(-1).astype(jnp.float32),
        (0.5 * w2).reshape(-1).astype(jnp.float32),   # fold avg1's 0.5 into conv2
        b2.reshape(-1).astype(jnp.float32),
        wfc.reshape(-1).astype(jnp.float32),
        bfc.reshape(-1).astype(jnp.float32),
    ])


def soil_h0_forward(soil, params, *, tile=256):
    """soil: (B, 11) float32. Returns (B, 9) float32."""
    B = soil.shape[0]
    soil = soil.astype(jnp.float32)
    packed = _pack_params(params)
    assert packed.shape == (_P_LEN,)

    # Batch chunks of 128 lanes each; pad B so it splits cleanly into blocks.
    chunks = pl.cdiv(B, LANES)
    if chunks <= tile:
        tile = chunks                       # single block == full array dims
        chunks_pad = chunks
    else:
        tile = max(8, (tile // 8) * 8)      # keep sublane-aligned blocks
        chunks_pad = pl.cdiv(chunks, tile) * tile
    b_pad = chunks_pad * LANES

    # Batch-on-lanes layout: (feature, chunk, 128).
    x = jnp.pad(soil, ((0, b_pad - B), (0, 0)))
    x = x.reshape(chunks_pad, LANES, 11).transpose(2, 0, 1)     # (11, chunks, 128)

    # Advisory cost for XLA's scheduler around the custom call.
    cost = pl.CostEstimate(
        flops=390 * b_pad,
        transcendentals=40 * b_pad,
        bytes_accessed=(11 + 1 + SOIL_K2) * 4 * b_pad,
    )

    out3 = pl.pallas_call(
        soil_h0_kernel,
        out_shape=jax.ShapeDtypeStruct((1 + SOIL_K2, chunks_pad, LANES),
                                       jnp.float32),
        grid=(chunks_pad // tile,),
        in_specs=[
            pl.BlockSpec(memory_space=pltpu.MemorySpace.SMEM),   # packed params
            pl.BlockSpec((11, tile, LANES), lambda i: (0, i, 0)),
        ],
        out_specs=pl.BlockSpec((1 + SOIL_K2, tile, LANES), lambda i: (0, i, 0)),
        compiler_params=pltpu.CompilerParams(
            dimension_semantics=("parallel",)),
        cost_estimate=cost,
    )(packed, x)

    # Back to (B, 9).
    out = out3.transpose(1, 2, 0).reshape(b_pad, 1 + SOIL_K2)
    return out[:B]


def init_params(key):
    """Deterministic synthetic parameters matching the nn.Module shapes."""
    k1, k2, k3, k4, k5, k6 = jax.random.split(key, 6)
    w1 = jax.random.normal(k1, (SOIL_K1, 1, 2), jnp.float32) * 0.5        # conv1.weight
    b1 = jax.random.normal(k2, (SOIL_K1,), jnp.float32) * 0.1             # conv1.bias
    w2 = jax.random.normal(k3, (SOIL_K2, SOIL_K1, 2), jnp.float32) * 0.5  # conv2.weight
    b2 = jax.random.normal(k4, (SOIL_K2,), jnp.float32) * 0.1             # conv2.bias
    wfc = jax.random.normal(k5, (1, 4), jnp.float32) * 0.5                # fc.weight
    bfc = jax.random.normal(k6, (1,), jnp.float32) * 0.1                  # fc.bias
    return w1, b1, w2, b2, wfc, bfc


def reference_forward(soil, params):
    """Pure-JAX reference (mirrors the PyTorch module) for validation."""
    w1, b1, w2, b2, wfc, bfc = params
    soil = soil.astype(jnp.float32)
    clay = soil[:, 1:8][:, None, :]                                  # (B,1,7) NCH
    other = jnp.concatenate([soil[:, 0:1], soil[:, 8:11]], axis=1)   # (B,4)
    fc_out = other @ wfc.T + bfc                                     # (B,1)

    dn = ('NCH', 'OIH', 'NCH')
    o1 = lax.conv_general_dilated(clay, w1, (1,), 'VALID',
                                  dimension_numbers=dn) + b1[None, :, None]
    o1 = jnp.tanh(o1)                                                # (B,4,6)
    p1 = 0.5 * (o1[:, :, 0::2] + o1[:, :, 1::2])                     # (B,4,3)
    o2 = lax.conv_general_dilated(p1, w2, (1,), 'VALID',
                                  dimension_numbers=dn) + b2[None, :, None]
    o2 = jnp.tanh(o2)                                                # (B,8,2)
    enc = 0.5 * (o2[:, :, 0] + o2[:, :, 1])                          # (B,8)
    return jnp.concatenate([fc_out, enc], axis=1)                    # (B,9)


if __name__ == "__main__":
    key = jax.random.PRNGKey(0)
    kp, kx1, kx2 = jax.random.split(key, 3)
    params = init_params(kp)

    # Small batch (module-scale test): single block, grid=(1,).
    B = 8
    soil = jax.random.normal(kx1, (B, 11), jnp.float32)
    out = jax.block_until_ready(soil_h0_forward(soil, params))
    ref = reference_forward(soil, params)
    assert out.shape == (B, 9), out.shape
    assert jnp.allclose(out, ref, atol=1e-5, rtol=1e-5), \
        f"max err {jnp.max(jnp.abs(out - ref))}"

    # Larger batch exercising padding + a multi-step parallel grid.
    B2 = 1200
    soil2 = jax.random.normal(kx2, (B2, 11), jnp.float32)
    out2 = jax.block_until_ready(soil_h0_forward(soil2, params, tile=8))
    ref2 = reference_forward(soil2, params)
    assert out2.shape == (B2, 9), out2.shape
    assert jnp.allclose(out2, ref2, atol=1e-5, rtol=1e-5), \
        f"max err {jnp.max(jnp.abs(out2 - ref2))}"

    print("KERNEL_OK")
</pallas_src>

<mosaic_0001>
module attributes {stable_mosaic.version = 11 : i64} {
  func.func @soil_h0_kernel(%arg0: i32, %arg1: memref<89xf32, #tpu.memory_space<smem>>, %arg2: memref<11x1x128xf32, #tpu.memory_space<vmem>>, %arg3: memref<9x1x128xf32, #tpu.memory_space<vmem>>) attributes {dimension_semantics = [#tpu.dimension_semantics<parallel>], iteration_bounds = array<i64: 1>, scalar_prefetch = 0 : i64, scratch_operands = 0 : i64, tpu.core_type = #tpu.core_type<tc>, window_params = [{transform_indices = @transform_0, window_bounds = array<i64: 89>}, {transform_indices = @transform_1, window_bounds = array<i64: 11, 1, 128>}, {transform_indices = @transform_2, window_bounds = array<i64: 9, 1, 128>}]} {
    %c0 = arith.constant 0 : index
    %0 = memref.load %arg1[%c0] : memref<89xf32, #tpu.memory_space<smem>>
    %c1 = arith.constant 1 : index
    %1 = memref.load %arg1[%c1] : memref<89xf32, #tpu.memory_space<smem>>
    %c2 = arith.constant 2 : index
    %2 = memref.load %arg1[%c2] : memref<89xf32, #tpu.memory_space<smem>>
    %c3 = arith.constant 3 : index
    %3 = memref.load %arg1[%c3] : memref<89xf32, #tpu.memory_space<smem>>
    %c4 = arith.constant 4 : index
    %4 = memref.load %arg1[%c4] : memref<89xf32, #tpu.memory_space<smem>>
    %c5 = arith.constant 5 : index
    %5 = memref.load %arg1[%c5] : memref<89xf32, #tpu.memory_space<smem>>
    %c6 = arith.constant 6 : index
    %6 = memref.load %arg1[%c6] : memref<89xf32, #tpu.memory_space<smem>>
    %c7 = arith.constant 7 : index
    %7 = memref.load %arg1[%c7] : memref<89xf32, #tpu.memory_space<smem>>
    %c8 = arith.constant 8 : index
    %8 = memref.load %arg1[%c8] : memref<89xf32, #tpu.memory_space<smem>>
    %c9 = arith.constant 9 : index
    %9 = memref.load %arg1[%c9] : memref<89xf32, #tpu.memory_space<smem>>
    %c10 = arith.constant 10 : index
    %10 = memref.load %arg1[%c10] : memref<89xf32, #tpu.memory_space<smem>>
    %c11 = arith.constant 11 : index
    %11 = memref.load %arg1[%c11] : memref<89xf32, #tpu.memory_space<smem>>
    %c12 = arith.constant 12 : index
    %12 = memref.load %arg1[%c12] : memref<89xf32, #tpu.memory_space<smem>>
    %c13 = arith.constant 13 : index
    %13 = memref.load %arg1[%c13] : memref<89xf32, #tpu.memory_space<smem>>
    %c14 = arith.constant 14 : index
    %14 = memref.load %arg1[%c14] : memref<89xf32, #tpu.memory_space<smem>>
    %c15 = arith.constant 15 : index
    %15 = memref.load %arg1[%c15] : memref<89xf32, #tpu.memory_space<smem>>
    %c16 = arith.constant 16 : index
    %16 = memref.load %arg1[%c16] : memref<89xf32, #tpu.memory_space<smem>>
    %c17 = arith.constant 17 : index
    %17 = memref.load %arg1[%c17] : memref<89xf32, #tpu.memory_space<smem>>
    %c18 = arith.constant 18 : index
    %18 = memref.load %arg1[%c18] : memref<89xf32, #tpu.memory_space<smem>>
    %c19 = arith.constant 19 : index
    %19 = memref.load %arg1[%c19] : memref<89xf32, #tpu.memory_space<smem>>
    %c20 = arith.constant 20 : index
    %20 = memref.load %arg1[%c20] : memref<89xf32, #tpu.memory_space<smem>>
    %c21 = arith.constant 21 : index
    %21 = memref.load %arg1[%c21] : memref<89xf32, #tpu.memory_space<smem>>
    %c22 = arith.constant 22 : index
    %22 = memref.load %arg1[%c22] : memref<89xf32, #tpu.memory_space<smem>>
    %c23 = arith.constant 23 : index
    %23 = memref.load %arg1[%c23] : memref<89xf32, #tpu.memory_space<smem>>
    %c24 = arith.constant 24 : index
    %24 = memref.load %arg1[%c24] : memref<89xf32, #tpu.memory_space<smem>>
    %c25 = arith.constant 25 : index
    %25 = memref.load %arg1[%c25] : memref<89xf32, #tpu.memory_space<smem>>
    %c26 = arith.constant 26 : index
    %26 = memref.load %arg1[%c26] : memref<89xf32, #tpu.memory_space<smem>>
    %c27 = arith.constant 27 : index
    %27 = memref.load %arg1[%c27] : memref<89xf32, #tpu.memory_space<smem>>
    %c28 = arith.constant 28 : index
    %28 = memref.load %arg1[%c28] : memref<89xf32, #tpu.memory_space<smem>>
    %c29 = arith.constant 29 : index
    %29 = memref.load %arg1[%c29] : memref<89xf32, #tpu.memory_space<smem>>
    %c30 = arith.constant 30 : index
    %30 = memref.load %arg1[%c30] : memref<89xf32, #tpu.memory_space<smem>>
    %c31 = arith.constant 31 : index
    %31 = memref.load %arg1[%c31] : memref<89xf32, #tpu.memory_space<smem>>
    %c32 = arith.constant 32 : index
    %32 = memref.load %arg1[%c32] : memref<89xf32, #tpu.memory_space<smem>>
    %c33 = arith.constant 33 : index
    %33 = memref.load %arg1[%c33] : memref<89xf32, #tpu.memory_space<smem>>
    %c34 = arith.constant 34 : index
    %34 = memref.load %arg1[%c34] : memref<89xf32, #tpu.memory_space<smem>>
    %c35 = arith.constant 35 : index
    %35 = memref.load %arg1[%c35] : memref<89xf32, #tpu.memory_space<smem>>
    %c36 = arith.constant 36 : index
    %36 = memref.load %arg1[%c36] : memref<89xf32, #tpu.memory_space<smem>>
    %c37 = arith.constant 37 : index
    %37 = memref.load %arg1[%c37] : memref<89xf32, #tpu.memory_space<smem>>
    %c38 = arith.constant 38 : index
    %38 = memref.load %arg1[%c38] : memref<89xf32, #tpu.memory_space<smem>>
    %c39 = arith.constant 39 : index
    %39 = memref.load %arg1[%c39] : memref<89xf32, #tpu.memory_space<smem>>
    %c40 = arith.constant 40 : index
    %40 = memref.load %arg1[%c40] : memref<89xf32, #tpu.memory_space<smem>>
    %c41 = arith.constant 41 : index
    %41 = memref.load %arg1[%c41] : memref<89xf32, #tpu.memory_space<smem>>
    %c42 = arith.constant 42 : index
    %42 = memref.load %arg1[%c42] : memref<89xf32, #tpu.memory_space<smem>>
    %c43 = arith.constant 43 : index
    %43 = memref.load %arg1[%c43] : memref<89xf32, #tpu.memory_space<smem>>
    %c44 = arith.constant 44 : index
    %44 = memref.load %arg1[%c44] : memref<89xf32, #tpu.memory_space<smem>>
    %c45 = arith.constant 45 : index
    %45 = memref.load %arg1[%c45] : memref<89xf32, #tpu.memory_space<smem>>
    %c46 = arith.constant 46 : index
    %46 = memref.load %arg1[%c46] : memref<89xf32, #tpu.memory_space<smem>>
    %c47 = arith.constant 47 : index
    %47 = memref.load %arg1[%c47] : memref<89xf32, #tpu.memory_space<smem>>
    %c48 = arith.constant 48 : index
    %48 = memref.load %arg1[%c48] : memref<89xf32, #tpu.memory_space<smem>>
    %c49 = arith.constant 49 : index
    %49 = memref.load %arg1[%c49] : memref<89xf32, #tpu.memory_space<smem>>
    %c50 = arith.constant 50 : index
    %50 = memref.load %arg1[%c50] : memref<89xf32, #tpu.memory_space<smem>>
    %c51 = arith.constant 51 : index
    %51 = memref.load %arg1[%c51] : memref<89xf32, #tpu.memory_space<smem>>
    %c52 = arith.constant 52 : index
    %52 = memref.load %arg1[%c52] : memref<89xf32, #tpu.memory_space<smem>>
    %c53 = arith.constant 53 : index
    %53 = memref.load %arg1[%c53] : memref<89xf32, #tpu.memory_space<smem>>
    %c54 = arith.constant 54 : index
    %54 = memref.load %arg1[%c54] : memref<89xf32, #tpu.memory_space<smem>>
    %c55 = arith.constant 55 : index
    %55 = memref.load %arg1[%c55] : memref<89xf32, #tpu.memory_space<smem>>
    %c56 = arith.constant 56 : index
    %56 = memref.load %arg1[%c56] : memref<89xf32, #tpu.memory_space<smem>>
    %c57 = arith.constant 57 : index
    %57 = memref.load %arg1[%c57] : memref<89xf32, #tpu.memory_space<smem>>
    %c58 = arith.constant 58 : index
    %58 = memref.load %arg1[%c58] : memref<89xf32, #tpu.memory_space<smem>>
    %c59 = arith.constant 59 : index
    %59 = memref.load %arg1[%c59] : memref<89xf32, #tpu.memory_space<smem>>
    %c60 = arith.constant 60 : index
    %60 = memref.load %arg1[%c60] : memref<89xf32, #tpu.memory_space<smem>>
    %c61 = arith.constant 61 : index
    %61 = memref.load %arg1[%c61] : memref<89xf32, #tpu.memory_space<smem>>
    %c62 = arith.constant 62 : index
    %62 = memref.load %arg1[%c62] : memref<89xf32, #tpu.memory_space<smem>>
    %c63 = arith.constant 63 : index
    %63 = memref.load %arg1[%c63] : memref<89xf32, #tpu.memory_space<smem>>
    %c64 = arith.constant 64 : index
    %64 = memref.load %arg1[%c64] : memref<89xf32, #tpu.memory_space<smem>>
    %c65 = arith.constant 65 : index
    %65 = memref.load %arg1[%c65] : memref<89xf32, #tpu.memory_space<smem>>
    %c66 = arith.constant 66 : index
    %66 = memref.load %arg1[%c66] : memref<89xf32, #tpu.memory_space<smem>>
    %c67 = arith.constant 67 : index
    %67 = memref.load %arg1[%c67] : memref<89xf32, #tpu.memory_space<smem>>
    %c68 = arith.constant 68 : index
    %68 = memref.load %arg1[%c68] : memref<89xf32, #tpu.memory_space<smem>>
    %c69 = arith.constant 69 : index
    %69 = memref.load %arg1[%c69] : memref<89xf32, #tpu.memory_space<smem>>
    %c70 = arith.constant 70 : index
    %70 = memref.load %arg1[%c70] : memref<89xf32, #tpu.memory_space<smem>>
    %c71 = arith.constant 71 : index
    %71 = memref.load %arg1[%c71] : memref<89xf32, #tpu.memory_space<smem>>
    %c72 = arith.constant 72 : index
    %72 = memref.load %arg1[%c72] : memref<89xf32, #tpu.memory_space<smem>>
    %c73 = arith.constant 73 : index
    %73 = memref.load %arg1[%c73] : memref<89xf32, #tpu.memory_space<smem>>
    %c74 = arith.constant 74 : index
    %74 = memref.load %arg1[%c74] : memref<89xf32, #tpu.memory_space<smem>>
    %c75 = arith.constant 75 : index
    %75 = memref.load %arg1[%c75] : memref<89xf32, #tpu.memory_space<smem>>
    %c76 = arith.constant 76 : index
    %76 = memref.load %arg1[%c76] : memref<89xf32, #tpu.memory_space<smem>>
    %c77 = arith.constant 77 : index
    %77 = memref.load %arg1[%c77] : memref<89xf32, #tpu.memory_space<smem>>
    %c78 = arith.constant 78 : index
    %78 = memref.load %arg1[%c78] : memref<89xf32, #tpu.memory_space<smem>>
    %c79 = arith.constant 79 : index
    %79 = memref.load %arg1[%c79] : memref<89xf32, #tpu.memory_space<smem>>
    %c80 = arith.constant 80 : index
    %80 = memref.load %arg1[%c80] : memref<89xf32, #tpu.memory_space<smem>>
    %c81 = arith.constant 81 : index
    %81 = memref.load %arg1[%c81] : memref<89xf32, #tpu.memory_space<smem>>
    %c82 = arith.constant 82 : index
    %82 = memref.load %arg1[%c82] : memref<89xf32, #tpu.memory_space<smem>>
    %c83 = arith.constant 83 : index
    %83 = memref.load %arg1[%c83] : memref<89xf32, #tpu.memory_space<smem>>
    %c84 = arith.constant 84 : index
    %84 = memref.load %arg1[%c84] : memref<89xf32, #tpu.memory_space<smem>>
    %c85 = arith.constant 85 : index
    %85 = memref.load %arg1[%c85] : memref<89xf32, #tpu.memory_space<smem>>
    %c86 = arith.constant 86 : index
    %86 = memref.load %arg1[%c86] : memref<89xf32, #tpu.memory_space<smem>>
    %c87 = arith.constant 87 : index
    %87 = memref.load %arg1[%c87] : memref<89xf32, #tpu.memory_space<smem>>
    %c88 = arith.constant 88 : index
    %88 = memref.load %arg1[%c88] : memref<89xf32, #tpu.memory_space<smem>>
    %c0_0 = arith.constant 0 : index
    %c0_1 = arith.constant 0 : index
    %c0_2 = arith.constant 0 : index
    %89 = vector.load %arg2[%c0_0, %c0_1, %c0_2] : memref<11x1x128xf32, #tpu.memory_space<vmem>>, vector<1x1x128xf32>
    %90 = vector.shape_cast %89 : vector<1x1x128xf32> to vector<1x128xf32>
    %91 = vector.broadcast %84 : f32 to vector<1x128xf32>
    %92 = arith.mulf %91, %90 : vector<1x128xf32>
    %c8_3 = arith.constant 8 : index
    %c0_4 = arith.constant 0 : index
    %c0_5 = arith.constant 0 : index
    %93 = vector.load %arg2[%c8_3, %c0_4, %c0_5] : memref<11x1x128xf32, #tpu.memory_space<vmem>>, vector<1x1x128xf32>
    %94 = vector.shape_cast %93 : vector<1x1x128xf32> to vector<1x128xf32>
    %95 = vector.broadcast %85 : f32 to vector<1x128xf32>
    %96 = arith.mulf %95, %94 : vector<1x128xf32>
    %97 = arith.addf %92, %96 : vector<1x128xf32>
    %c9_6 = arith.constant 9 : index
    %c0_7 = arith.constant 0 : index
    %c0_8 = arith.constant 0 : index
    %98 = vector.load %arg2[%c9_6, %c0_7, %c0_8] : memref<11x1x128xf32, #tpu.memory_space<vmem>>, vector<1x1x128xf32>
    %99 = vector.shape_cast %98 : vector<1x1x128xf32> to vector<1x128xf32>
    %100 = vector.broadcast %86 : f32 to vector<1x128xf32>
    %101 = arith.mulf %100, %99 : vector<1x128xf32>
    %c10_9 = arith.constant 10 : index
    %c0_10 = arith.constant 0 : index
    %c0_11 = arith.constant 0 : index
    %102 = vector.load %arg2[%c10_9, %c0_10, %c0_11] : memref<11x1x128xf32, #tpu.memory_space<vmem>>, vector<1x1x128xf32>
    %103 = vector.shape_cast %102 : vector<1x1x128xf32> to vector<1x128xf32>
    %104 = vector.broadcast %87 : f32 to vector<1x128xf32>
    %105 = arith.mulf %104, %103 : vector<1x128xf32>
    %106 = arith.addf %101, %105 : vector<1x128xf32>
    %107 = vector.broadcast %88 : f32 to vector<1x128xf32>
    %108 = arith.addf %106, %107 : vector<1x128xf32>
    %109 = arith.addf %97, %108 : vector<1x128xf32>
    %c0_12 = arith.constant 0 : index
    %c0_13 = arith.constant 0 : index
    %c0_14 = arith.constant 0 : index
    %110 = vector.load %arg3[%c0_12, %c0_13, %c0_14] : memref<9x1x128xf32, #tpu.memory_space<vmem>>, vector<1x1x128xf32>
    %111 = vector.shape_cast %110 : vector<1x1x128xf32> to vector<1x128xf32>
    %112 = vector.shape_cast %109 : vector<1x128xf32> to vector<1x1x128xf32>
    tpu.vector_store %arg3[%c0_12, %c0_13, %c0_14], %112 {strides = array<i32>} : memref<9x1x128xf32, #tpu.memory_space<vmem>>, vector<1x1x128xf32>,
    %c1_15 = arith.constant 1 : index
    %c0_16 = arith.constant 0 : index
    %c0_17 = arith.constant 0 : index
    %113 = vector.load %arg2[%c1_15, %c0_16, %c0_17] : memref<11x1x128xf32, #tpu.memory_space<vmem>>, vector<1x1x128xf32>
    %114 = vector.shape_cast %113 : vector<1x1x128xf32> to vector<1x128xf32>
    %c2_18 = arith.constant 2 : index
    %c0_19 = arith.constant 0 : index
    %c0_20 = arith.constant 0 : index
    %115 = vector.load %arg2[%c2_18, %c0_19, %c0_20] : memref<11x1x128xf32, #tpu.memory_space<vmem>>, vector<1x1x128xf32>
    %116 = vector.shape_cast %115 : vector<1x1x128xf32> to vector<1x128xf32>
    %c3_21 = arith.constant 3 : index
    %c0_22 = arith.constant 0 : index
    %c0_23 = arith.constant 0 : index
    %117 = vector.load %arg2[%c3_21, %c0_22, %c0_23] : memref<11x1x128xf32, #tpu.memory_space<vmem>>, vector<1x1x128xf32>
    %118 = vector.shape_cast %117 : vector<1x1x128xf32> to vector<1x128xf32>
    %c4_24 = arith.constant 4 : index
    %c0_25 = arith.constant 0 : index
    %c0_26 = arith.constant 0 : index
    %119 = vector.load %arg2[%c4_24, %c0_25, %c0_26] : memref<11x1x128xf32, #tpu.memory_space<vmem>>, vector<1x1x128xf32>
    %120 = vector.shape_cast %119 : vector<1x1x128xf32> to vector<1x128xf32>
    %c5_27 = arith.constant 5 : index
    %c0_28 = arith.constant 0 : index
    %c0_29 = arith.constant 0 : index
    %121 = vector.load %arg2[%c5_27, %c0_28, %c0_29] : memref<11x1x128xf32, #tpu.memory_space<vmem>>, vector<1x1x128xf32>
    %122 = vector.shape_cast %121 : vector<1x1x128xf32> to vector<1x128xf32>
    %c6_30 = arith.constant 6 : index
    %c0_31 = arith.constant 0 : index
    %c0_32 = arith.constant 0 : index
    %123 = vector.load %arg2[%c6_30, %c0_31, %c0_32] : memref<11x1x128xf32, #tpu.memory_space<vmem>>, vector<1x1x128xf32>
    %124 = vector.shape_cast %123 : vector<1x1x128xf32> to vector<1x128xf32>
    %c7_33 = arith.constant 7 : index
    %c0_34 = arith.constant 0 : index
    %c0_35 = arith.constant 0 : index
    %125 = vector.load %arg2[%c7_33, %c0_34, %c0_35] : memref<11x1x128xf32, #tpu.memory_space<vmem>>, vector<1x1x128xf32>
    %126 = vector.shape_cast %125 : vector<1x1x128xf32> to vector<1x128xf32>
    %127 = vector.broadcast %0 : f32 to vector<1x128xf32>
    %128 = arith.mulf %127, %114 : vector<1x128xf32>
    %129 = vector.broadcast %1 : f32 to vector<1x128xf32>
    %130 = arith.mulf %129, %116 : vector<1x128xf32>
    %131 = arith.addf %128, %130 : vector<1x128xf32>
    %132 = vector.broadcast %8 : f32 to vector<1x128xf32>
    %133 = arith.addf %131, %132 : vector<1x128xf32>
    %134 = math.tanh %133 : vector<1x128xf32>
    %135 = vector.broadcast %0 : f32 to vector<1x128xf32>
    %136 = arith.mulf %135, %116 : vector<1x128xf32>
    %137 = vector.broadcast %1 : f32 to vector<1x128xf32>
    %138 = arith.mulf %137, %118 : vector<1x128xf32>
    %139 = arith.addf %136, %138 : vector<1x128xf32>
    %140 = vector.broadcast %8 : f32 to vector<1x128xf32>
    %141 = arith.addf %139, %140 : vector<1x128xf32>
    %142 = math.tanh %141 : vector<1x128xf32>
    %143 = vector.broadcast %0 : f32 to vector<1x128xf32>
    %144 = arith.mulf %143, %118 : vector<1x128xf32>
    %145 = vector.broadcast %1 : f32 to vector<1x128xf32>
    %146 = arith.mulf %145, %120 : vector<1x128xf32>
    %147 = arith.addf %144, %146 : vector<1x128xf32>
    %148 = vector.broadcast %8 : f32 to vector<1x128xf32>
    %149 = arith.addf %147, %148 : vector<1x128xf32>
    %150 = math.tanh %149 : vector<1x128xf32>
    %151 = vector.broadcast %0 : f32 to vector<1x128xf32>
    %152 = arith.mulf %151, %120 : vector<1x128xf32>
    %153 = vector.broadcast %1 : f32 to vector<1x128xf32>
    %154 = arith.mulf %153, %122 : vector<1x128xf32>
    %155 = arith.addf %152, %154 : vector<1x128xf32>
    %156 = vector.broadcast %8 : f32 to vector<1x128xf32>
    %157 = arith.addf %155, %156 : vector<1x128xf32>
    %158 = math.tanh %157 : vector<1x128xf32>
    %159 = vector.broadcast %0 : f32 to vector<1x128xf32>
    %160 = arith.mulf %159, %122 : vector<1x128xf32>
    %161 = vector.broadcast %1 : f32 to vector<1x128xf32>
    %162 = arith.mulf %161, %124 : vector<1x128xf32>
    %163 = arith.addf %160, %162 : vector<1x128xf32>
    %164 = vector.broadcast %8 : f32 to vector<1x128xf32>
    %165 = arith.addf %163, %164 : vector<1x128xf32>
    %166 = math.tanh %165 : vector<1x128xf32>
    %167 = vector.broadcast %0 : f32 to vector<1x128xf32>
    %168 = arith.mulf %167, %124 : vector<1x128xf32>
    %169 = vector.broadcast %1 : f32 to vector<1x128xf32>
    %170 = arith.mulf %169, %126 : vector<1x128xf32>
    %171 = arith.addf %168, %170 : vector<1x128xf32>
    %172 = vector.broadcast %8 : f32 to vector<1x128xf32>
    %173 = arith.addf %171, %172 : vector<1x128xf32>
    %174 = math.tanh %173 : vector<1x128xf32>
    %175 = vector.broadcast %2 : f32 to vector<1x128xf32>
    %176 = arith.mulf %175, %114 : vector<1x128xf32>
    %177 = vector.broadcast %3 : f32 to vector<1x128xf32>
    %178 = arith.mulf %177, %116 : vector<1x128xf32>
    %179 = arith.addf %176, %178 : vector<1x128xf32>
    %180 = vector.broadcast %9 : f32 to vector<1x128xf32>
    %181 = arith.addf %179, %180 : vector<1x128xf32>
    %182 = math.tanh %181 : vector<1x128xf32>
    %183 = vector.broadcast %2 : f32 to vector<1x128xf32>
    %184 = arith.mulf %183, %116 : vector<1x128xf32>
    %185 = vector.broadcast %3 : f32 to vector<1x128xf32>
    %186 = arith.mulf %185, %118 : vector<1x128xf32>
    %187 = arith.addf %184, %186 : vector<1x128xf32>
    %188 = vector.broadcast %9 : f32 to vector<1x128xf32>
    %189 = arith.addf %187, %188 : vector<1x128xf32>
    %190 = math.tanh %189 : vector<1x128xf32>
    %191 = vector.broadcast %2 : f32 to vector<1x128xf32>
    %192 = arith.mulf %191, %118 : vector<1x128xf32>
    %193 = vector.broadcast %3 : f32 to vector<1x128xf32>
    %194 = arith.mulf %193, %120 : vector<1x128xf32>
    %195 = arith.addf %192, %194 : vector<1x128xf32>
    %196 = vector.broadcast %9 : f32 to vector<1x128xf32>
    %197 = arith.addf %195, %196 : vector<1x128xf32>
    %198 = math.tanh %197 : vector<1x128xf32>
    %199 = vector.broadcast %2 : f32 to vector<1x128xf32>
    %200 = arith.mulf %199, %120 : vector<1x128xf32>
    %201 = vector.broadcast %3 : f32 to vector<1x128xf32>
    %202 = arith.mulf %201, %122 : vector<1x128xf32>
    %203 = arith.addf %200, %202 : vector<1x128xf32>
    %204 = vector.broadcast %9 : f32 to vector<1x128xf32>
    %205 = arith.addf %203, %204 : vector<1x128xf32>
    %206 = math.tanh %205 : vector<1x128xf32>
    %207 = vector.broadcast %2 : f32 to vector<1x128xf32>
    %208 = arith.mulf %207, %122 : vector<1x128xf32>
    %209 = vector.broadcast %3 : f32 to vector<1x128xf32>
    %210 = arith.mulf %209, %124 : vector<1x128xf32>
    %211 = arith.addf %208, %210 : vector<1x128xf32>
    %212 = vector.broadcast %9 : f32 to vector<1x128xf32>
    %213 = arith.addf %211, %212 : vector<1x128xf32>
    %214 = math.tanh %213 : vector<1x128xf32>
    %215 = vector.broadcast %2 : f32 to vector<1x128xf32>
    %216 = arith.mulf %215, %124 : vector<1x128xf32>
    %217 = vector.broadcast %3 : f32 to vector<1x128xf32>
    %218 = arith.mulf %217, %126 : vector<1x128xf32>
    %219 = arith.addf %216, %218 : vector<1x128xf32>
    %220 = vector.broadcast %9 : f32 to vector<1x128xf32>
    %221 = arith.addf %219, %220 : vector<1x128xf32>
    %222 = math.tanh %221 : vector<1x128xf32>
    %223 = vector.broadcast %4 : f32 to vector<1x128xf32>
    %224 = arith.mulf %223, %114 : vector<1x128xf32>
    %225 = vector.broadcast %5 : f32 to vector<1x128xf32>
    %226 = arith.mulf %225, %116 : vector<1x128xf32>
    %227 = arith.addf %224, %226 : vector<1x128xf32>
    %228 = vector.broadcast %10 : f32 to vector<1x128xf32>
    %229 = arith.addf %227, %228 : vector<1x128xf32>
    %230 = math.tanh %229 : vector<1x128xf32>
    %231 = vector.broadcast %4 : f32 to vector<1x128xf32>
    %232 = arith.mulf %231, %116 : vector<1x128xf32>
    %233 = vector.broadcast %5 : f32 to vector<1x128xf32>
    %234 = arith.mulf %233, %118 : vector<1x128xf32>
    %235 = arith.addf %232, %234 : vector<1x128xf32>
    %236 = vector.broadcast %10 : f32 to vector<1x128xf32>
    %237 = arith.addf %235, %236 : vector<1x128xf32>
    %238 = math.tanh %237 : vector<1x128xf32>
    %239 = vector.broadcast %4 : f32 to vector<1x128xf32>
    %240 = arith.mulf %239, %118 : vector<1x128xf32>
    %241 = vector.broadcast %5 : f32 to vector<1x128xf32>
    %242 = arith.mulf %241, %120 : vector<1x128xf32>
    %243 = arith.addf %240, %242 : vector<1x128xf32>
    %244 = vector.broadcast %10 : f32 to vector<1x128xf32>
    %245 = arith.addf %243, %244 : vector<1x128xf32>
    %246 = math.tanh %245 : vector<1x128xf32>
    %247 = vector.broadcast %4 : f32 to vector<1x128xf32>
    %248 = arith.mulf %247, %120 : vector<1x128xf32>
    %249 = vector.broadcast %5 : f32 to vector<1x128xf32>
    %250 = arith.mulf %249, %122 : vector<1x128xf32>
    %251 = arith.addf %248, %250 : vector<1x128xf32>
    %252 = vector.broadcast %10 : f32 to vector<1x128xf32>
    %253 = arith.addf %251, %252 : vector<1x128xf32>
    %254 = math.tanh %253 : vector<1x128xf32>
    %255 = vector.broadcast %4 : f32 to vector<1x128xf32>
    %256 = arith.mulf %255, %122 : vector<1x128xf32>
    %257 = vector.broadcast %5 : f32 to vector<1x128xf32>
    %258 = arith.mulf %257, %124 : vector<1x128xf32>
    %259 = arith.addf %256, %258 : vector<1x128xf32>
    %260 = vector.broadcast %10 : f32 to vector<1x128xf32>
    %261 = arith.addf %259, %260 : vector<1x128xf32>
    %262 = math.tanh %261 : vector<1x128xf32>
    %263 = vector.broadcast %4 : f32 to vector<1x128xf32>
    %264 = arith.mulf %263, %124 : vector<1x128xf32>
    %265 = vector.broadcast %5 : f32 to vector<1x128xf32>
    %266 = arith.mulf %265, %126 : vector<1x128xf32>
    %267 = arith.addf %264, %266 : vector<1x128xf32>
    %268 = vector.broadcast %10 : f32 to vector<1x128xf32>
    %269 = arith.addf %267, %268 : vector<1x128xf32>
    %270 = math.tanh %269 : vector<1x128xf32>
    %271 = vector.broadcast %6 : f32 to vector<1x128xf32>
    %272 = arith.mulf %271, %114 : vector<1x128xf32>
    %273 = vector.broadcast %7 : f32 to vector<1x128xf32>
    %274 = arith.mulf %273, %116 : vector<1x128xf32>
    %275 = arith.addf %272, %274 : vector<1x128xf32>
    %276 = vector.broadcast %11 : f32 to vector<1x128xf32>
    %277 = arith.addf %275, %276 : vector<1x128xf32>
    %278 = math.tanh %277 : vector<1x128xf32>
    %279 = vector.broadcast %6 : f32 to vector<1x128xf32>
    %280 = arith.mulf %279, %116 : vector<1x128xf32>
    %281 = vector.broadcast %7 : f32 to vector<1x128xf32>
    %282 = arith.mulf %281, %118 : vector<1x128xf32>
    %283 = arith.addf %280, %282 : vector<1x128xf32>
    %284 = vector.broadcast %11 : f32 to vector<1x128xf32>
    %285 = arith.addf %283, %284 : vector<1x128xf32>
    %286 = math.tanh %285 : vector<1x128xf32>
    %287 = vector.broadcast %6 : f32 to vector<1x128xf32>
    %288 = arith.mulf %287, %118 : vector<1x128xf32>
    %289 = vector.broadcast %7 : f32 to vector<1x128xf32>
    %290 = arith.mulf %289, %120 : vector<1x128xf32>
    %291 = arith.addf %288, %290 : vector<1x128xf32>
    %292 = vector.broadcast %11 : f32 to vector<1x128xf32>
    %293 = arith.addf %291, %292 : vector<1x128xf32>
    %294 = math.tanh %293 : vector<1x128xf32>
    %295 = vector.broadcast %6 : f32 to vector<1x128xf32>
    %296 = arith.mulf %295, %120 : vector<1x128xf32>
    %297 = vector.broadcast %7 : f32 to vector<1x128xf32>
    %298 = arith.mulf %297, %122 : vector<1x128xf32>
    %299 = arith.addf %296, %298 : vector<1x128xf32>
    %300 = vector.broadcast %11 : f32 to vector<1x128xf32>
    %301 = arith.addf %299, %300 : vector<1x128xf32>
    %302 = math.tanh %301 : vector<1x128xf32>
    %303 = vector.broadcast %6 : f32 to vector<1x128xf32>
    %304 = arith.mulf %303, %122 : vector<1x128xf32>
    %305 = vector.broadcast %7 : f32 to vector<1x128xf32>
    %306 = arith.mulf %305, %124 : vector<1x128xf32>
    %307 = arith.addf %304, %306 : vector<1x128xf32>
    %308 = vector.broadcast %11 : f32 to vector<1x128xf32>
    %309 = arith.addf %307, %308 : vector<1x128xf32>
    %310 = math.tanh %309 : vector<1x128xf32>
    %311 = vector.broadcast %6 : f32 to vector<1x128xf32>
    %312 = arith.mulf %311, %124 : vector<1x128xf32>
    %313 = vector.broadcast %7 : f32 to vector<1x128xf32>
    %314 = arith.mulf %313, %126 : vector<1x128xf32>
    %315 = arith.addf %312, %314 : vector<1x128xf32>
    %316 = vector.broadcast %11 : f32 to vector<1x128xf32>
    %317 = arith.addf %315, %316 : vector<1x128xf32>
    %318 = math.tanh %317 : vector<1x128xf32>
    %319 = arith.addf %134, %142 : vector<1x128xf32>
    %320 = arith.addf %150, %158 : vector<1x128xf32>
    %321 = arith.addf %166, %174 : vector<1x128xf32>
    %322 = arith.addf %182, %190 : vector<1x128xf32>
    %323 = arith.addf %198, %206 : vector<1x128xf32>
    %324 = arith.addf %214, %222 : vector<1x128xf32>
    %325 = arith.addf %230, %238 : vector<1x128xf32>
    %326 = arith.addf %246, %254 : vector<1x128xf32>
    %327 = arith.addf %262, %270 : vector<1x128xf32>
    %328 = arith.addf %278, %286 : vector<1x128xf32>
    %329 = arith.addf %294, %302 : vector<1x128xf32>
    %330 = arith.addf %310, %318 : vector<1x128xf32>
    %331 = vector.broadcast %12 : f32 to vector<1x128xf32>
    %332 = arith.mulf %331, %319 : vector<1x128xf32>
    %333 = vector.broadcast %13 : f32 to vector<1x128xf32>
    %334 = arith.mulf %333, %320 : vector<1x128xf32>
    %335 = arith.addf %332, %334 : vector<1x128xf32>
    %336 = vector.broadcast %14 : f32 to vector<1x128xf32>
    %337 = arith.mulf %336, %322 : vector<1x128xf32>
    %338 = vector.broadcast %15 : f32 to vector<1x128xf32>
    %339 = arith.mulf %338, %323 : vector<1x128xf32>
    %340 = arith.addf %337, %339 : vector<1x128xf32>
    %341 = vector.broadcast %16 : f32 to vector<1x128xf32>
    %342 = arith.mulf %341, %325 : vector<1x128xf32>
    %343 = vector.broadcast %17 : f32 to vector<1x128xf32>
    %344 = arith.mulf %343, %326 : vector<1x128xf32>
    %345 = arith.addf %342, %344 : vector<1x128xf32>
    %346 = vector.broadcast %18 : f32 to vector<1x128xf32>
    %347 = arith.mulf %346, %328 : vector<1x128xf32>
    %348 = vector.broadcast %19 : f32 to vector<1x128xf32>
    %349 = arith.mulf %348, %329 : vector<1x128xf32>
    %350 = arith.addf %347, %349 : vector<1x128xf32>
    %351 = arith.addf %335, %340 : vector<1x128xf32>
    %352 = arith.addf %345, %350 : vector<1x128xf32>
    %353 = arith.addf %351, %352 : vector<1x128xf32>
    %354 = vector.broadcast %76 : f32 to vector<1x128xf32>
    %355 = arith.addf %353, %354 : vector<1x128xf32>
    %356 = math.tanh %355 : vector<1x128xf32>
    %357 = vector.broadcast %12 : f32 to vector<1x128xf32>
    %358 = arith.mulf %357, %320 : vector<1x128xf32>
    %359 = vector.broadcast %13 : f32 to vector<1x128xf32>
    %360 = arith.mulf %359, %321 : vector<1x128xf32>
    %361 = arith.addf %358, %360 : vector<1x128xf32>
    %362 = vector.broadcast %14 : f32 to vector<1x128xf32>
    %363 = arith.mulf %362, %323 : vector<1x128xf32>
    %364 = vector.broadcast %15 : f32 to vector<1x128xf32>
    %365 = arith.mulf %364, %324 : vector<1x128xf32>
    %366 = arith.addf %363, %365 : vector<1x128xf32>
    %367 = vector.broadcast %16 : f32 to vector<1x128xf32>
    %368 = arith.mulf %367, %326 : vector<1x128xf32>
    %369 = vector.broadcast %17 : f32 to vector<1x128xf32>
    %370 = arith.mulf %369, %327 : vector<1x128xf32>
    %371 = arith.addf %368, %370 : vector<1x128xf32>
    %372 = vector.broadcast %18 : f32 to vector<1x128xf32>
    %373 = arith.mulf %372, %329 : vector<1x128xf32>
    %374 = vector.broadcast %19 : f32 to vector<1x128xf32>
    %375 = arith.mulf %374, %330 : vector<1x128xf32>
    %376 = arith.addf %373, %375 : vector<1x128xf32>
    %377 = arith.addf %361, %366 : vector<1x128xf32>
    %378 = arith.addf %371, %376 : vector<1x128xf32>
    %379 = arith.addf %377, %378 : vector<1x128xf32>
    %380 = vector.broadcast %76 : f32 to vector<1x128xf32>
    %381 = arith.addf %379, %380 : vector<1x128xf32>
    %382 = math.tanh %381 : vector<1x128xf32>
    %383 = arith.addf %356, %382 : vector<1x128xf32>
    %cst = arith.constant 5.000000e-01 : f32
    %384 = vector.broadcast %cst : f32 to vector<1x128xf32>
    %385 = arith.mulf %384, %383 : vector<1x128xf32>
    %c1_36 = arith.constant 1 : index
    %c0_37 = arith.constant 0 : index
    %c0_38 = arith.constant 0 : index
    %386 = vector.load %arg3[%c1_36, %c0_37, %c0_38] : memref<9x1x128xf32, #tpu.memory_space<vmem>>, vector<1x1x128xf32>
    %387 = vector.shape_cast %386 : vector<1x1x128xf32> to vector<1x128xf32>
    %388 = vector.shape_cast %385 : vector<1x128xf32> to vector<1x1x128xf32>
    tpu.vector_store %arg3[%c1_36, %c0_37, %c0_38], %388 {strides = array<i32>} : memref<9x1x128xf32, #tpu.memory_space<vmem>>, vector<1x1x128xf32>,
    %389 = vector.broadcast %20 : f32 to vector<1x128xf32>
    %390 = arith.mulf %389, %319 : vector<1x128xf32>
    %391 = vector.broadcast %21 : f32 to vector<1x128xf32>
    %392 = arith.mulf %391, %320 : vector<1x128xf32>
    %393 = arith.addf %390, %392 : vector<1x128xf32>
    %394 = vector.broadcast %22 : f32 to vector<1x128xf32>
    %395 = arith.mulf %394, %322 : vector<1x128xf32>
    %396 = vector.broadcast %23 : f32 to vector<1x128xf32>
    %397 = arith.mulf %396, %323 : vector<1x128xf32>
    %398 = arith.addf %395, %397 : vector<1x128xf32>
    %399 = vector.broadcast %24 : f32 to vector<1x128xf32>
    %400 = arith.mulf %399, %325 : vector<1x128xf32>
    %401 = vector.broadcast %25 : f32 to vector<1x128xf32>
    %402 = arith.mulf %401, %326 : vector<1x128xf32>
    %403 = arith.addf %400, %402 : vector<1x128xf32>
    %404 = vector.broadcast %26 : f32 to vector<1x128xf32>
    %405 = arith.mulf %404, %328 : vector<1x128xf32>
    %406 = vector.broadcast %27 : f32 to vector<1x128xf32>
    %407 = arith.mulf %406, %329 : vector<1x128xf32>
    %408 = arith.addf %405, %407 : vector<1x128xf32>
    %409 = arith.addf %393, %398 : vector<1x128xf32>
    %410 = arith.addf %403, %408 : vector<1x128xf32>
    %411 = arith.addf %409, %410 : vector<1x128xf32>
    %412 = vector.broadcast %77 : f32 to vector<1x128xf32>
    %413 = arith.addf %411, %412 : vector<1x128xf32>
    %414 = math.tanh %413 : vector<1x128xf32>
    %415 = vector.broadcast %20 : f32 to vector<1x128xf32>
    %416 = arith.mulf %415, %320 : vector<1x128xf32>
    %417 = vector.broadcast %21 : f32 to vector<1x128xf32>
    %418 = arith.mulf %417, %321 : vector<1x128xf32>
    %419 = arith.addf %416, %418 : vector<1x128xf32>
    %420 = vector.broadcast %22 : f32 to vector<1x128xf32>
    %421 = arith.mulf %420, %323 : vector<1x128xf32>
    %422 = vector.broadcast %23 : f32 to vector<1x128xf32>
    %423 = arith.mulf %422, %324 : vector<1x128xf32>
    %424 = arith.addf %421, %423 : vector<1x128xf32>
    %425 = vector.broadcast %24 : f32 to vector<1x128xf32>
    %426 = arith.mulf %425, %326 : vector<1x128xf32>
    %427 = vector.broadcast %25 : f32 to vector<1x128xf32>
    %428 = arith.mulf %427, %327 : vector<1x128xf32>
    %429 = arith.addf %426, %428 : vector<1x128xf32>
    %430 = vector.broadcast %26 : f32 to vector<1x128xf32>
    %431 = arith.mulf %430, %329 : vector<1x128xf32>
    %432 = vector.broadcast %27 : f32 to vector<1x128xf32>
    %433 = arith.mulf %432, %330 : vector<1x128xf32>
    %434 = arith.addf %431, %433 : vector<1x128xf32>
    %435 = arith.addf %419, %424 : vector<1x128xf32>
    %436 = arith.addf %429, %434 : vector<1x128xf32>
    %437 = arith.addf %435, %436 : vector<1x128xf32>
    %438 = vector.broadcast %77 : f32 to vector<1x128xf32>
    %439 = arith.addf %437, %438 : vector<1x128xf32>
    %440 = math.tanh %439 : vector<1x128xf32>
    %441 = arith.addf %414, %440 : vector<1x128xf32>
    %cst_39 = arith.constant 5.000000e-01 : f32
    %442 = vector.broadcast %cst_39 : f32 to vector<1x128xf32>
    %443 = arith.mulf %442, %441 : vector<1x128xf32>
    %c2_40 = arith.constant 2 : index
    %c0_41 = arith.constant 0 : index
    %c0_42 = arith.constant 0 : index
    %444 = vector.load %arg3[%c2_40, %c0_41, %c0_42] : memref<9x1x128xf32, #tpu.memory_space<vmem>>, vector<1x1x128xf32>
    %445 = vector.shape_cast %444 : vector<1x1x128xf32> to vector<1x128xf32>
    %446 = vector.shape_cast %443 : vector<1x128xf32> to vector<1x1x128xf32>
    tpu.vector_store %arg3[%c2_40, %c0_41, %c0_42], %446 {strides = array<i32>} : memref<9x1x128xf32, #tpu.memory_space<vmem>>, vector<1x1x128xf32>,
    %447 = vector.broadcast %28 : f32 to vector<1x128xf32>
    %448 = arith.mulf %447, %319 : vector<1x128xf32>
    %449 = vector.broadcast %29 : f32 to vector<1x128xf32>
    %450 = arith.mulf %449, %320 : vector<1x128xf32>
    %451 = arith.addf %448, %450 : vector<1x128xf32>
    %452 = vector.broadcast %30 : f32 to vector<1x128xf32>
    %453 = arith.mulf %452, %322 : vector<1x128xf32>
    %454 = vector.broadcast %31 : f32 to vector<1x128xf32>
    %455 = arith.mulf %454, %323 : vector<1x128xf32>
    %456 = arith.addf %453, %455 : vector<1x128xf32>
    %457 = vector.broadcast %32 : f32 to vector<1x128xf32>
    %458 = arith.mulf %457, %325 : vector<1x128xf32>
    %459 = vector.broadcast %33 : f32 to vector<1x128xf32>
    %460 = arith.mulf %459, %326 : vector<1x128xf32>
    %461 = arith.addf %458, %460 : vector<1x128xf32>
    %462 = vector.broadcast %34 : f32 to vector<1x128xf32>
    %463 = arith.mulf %462, %328 : vector<1x128xf32>
    %464 = vector.broadcast %35 : f32 to vector<1x128xf32>
    %465 = arith.mulf %464, %329 : vector<1x128xf32>
    %466 = arith.addf %463, %465 : vector<1x128xf32>
    %467 = arith.addf %451, %456 : vector<1x128xf32>
    %468 = arith.addf %461, %466 : vector<1x128xf32>
    %469 = arith.addf %467, %468 : vector<1x128xf32>
    %470 = vector.broadcast %78 : f32 to vector<1x128xf32>
    %471 = arith.addf %469, %470 : vector<1x128xf32>
    %472 = math.tanh %471 : vector<1x128xf32>
    %473 = vector.broadcast %28 : f32 to vector<1x128xf32>
    %474 = arith.mulf %473, %320 : vector<1x128xf32>
    %475 = vector.broadcast %29 : f32 to vector<1x128xf32>
    %476 = arith.mulf %475, %321 : vector<1x128xf32>
    %477 = arith.addf %474, %476 : vector<1x128xf32>
    %478 = vector.broadcast %30 : f32 to vector<1x128xf32>
    %479 = arith.mulf %478, %323 : vector<1x128xf32>
    %480 = vector.broadcast %31 : f32 to vector<1x128xf32>
    %481 = arith.mulf %480, %324 : vector<1x128xf32>
    %482 = arith.addf %479, %481 : vector<1x128xf32>
    %483 = vector.broadcast %32 : f32 to vector<1x128xf32>
    %484 = arith.mulf %483, %326 : vector<1x128xf32>
    %485 = vector.broadcast %33 : f32 to vector<1x128xf32>
    %486 = arith.mulf %485, %327 : vector<1x128xf32>
    %487 = arith.addf %484, %486 : vector<1x128xf32>
    %488 = vector.broadcast %34 : f32 to vector<1x128xf32>
    %489 = arith.mulf %488, %329 : vector<1x128xf32>
    %490 = vector.broadcast %35 : f32 to vector<1x128xf32>
    %491 = arith.mulf %490, %330 : vector<1x128xf32>
    %492 = arith.addf %489, %491 : vector<1x128xf32>
    %493 = arith.addf %477, %482 : vector<1x128xf32>
    %494 = arith.addf %487, %492 : vector<1x128xf32>
    %495 = arith.addf %493, %494 : vector<1x128xf32>
    %496 = vector.broadcast %78 : f32 to vector<1x128xf32>
    %497 = arith.addf %495, %496 : vector<1x128xf32>
    %498 = math.tanh %497 : vector<1x128xf32>
    %499 = arith.addf %472, %498 : vector<1x128xf32>
    %cst_43 = arith.constant 5.000000e-01 : f32
    %500 = vector.broadcast %cst_43 : f32 to vector<1x128xf32>
    %501 = arith.mulf %500, %499 : vector<1x128xf32>
    %c3_44 = arith.constant 3 : index
    %c0_45 = arith.constant 0 : index
    %c0_46 = arith.constant 0 : index
    %502 = vector.load %arg3[%c3_44, %c0_45, %c0_46] : memref<9x1x128xf32, #tpu.memory_space<vmem>>, vector<1x1x128xf32>
    %503 = vector.shape_cast %502 : vector<1x1x128xf32> to vector<1x128xf32>
    %504 = vector.shape_cast %501 : vector<1x128xf32> to vector<1x1x128xf32>
    tpu.vector_store %arg3[%c3_44, %c0_45, %c0_46], %504 {strides = array<i32>} : memref<9x1x128xf32, #tpu.memory_space<vmem>>, vector<1x1x128xf32>,
    %505 = vector.broadcast %36 : f32 to vector<1x128xf32>
    %506 = arith.mulf %505, %319 : vector<1x128xf32>
    %507 = vector.broadcast %37 : f32 to vector<1x128xf32>
    %508 = arith.mulf %507, %320 : vector<1x128xf32>
    %509 = arith.addf %506, %508 : vector<1x128xf32>
    %510 = vector.broadcast %38 : f32 to vector<1x128xf32>
    %511 = arith.mulf %510, %322 : vector<1x128xf32>
    %512 = vector.broadcast %39 : f32 to vector<1x128xf32>
    %513 = arith.mulf %512, %323 : vector<1x128xf32>
    %514 = arith.addf %511, %513 : vector<1x128xf32>
    %515 = vector.broadcast %40 : f32 to vector<1x128xf32>
    %516 = arith.mulf %515, %325 : vector<1x128xf32>
    %517 = vector.broadcast %41 : f32 to vector<1x128xf32>
    %518 = arith.mulf %517, %326 : vector<1x128xf32>
    %519 = arith.addf %516, %518 : vector<1x128xf32>
    %520 = vector.broadcast %42 : f32 to vector<1x128xf32>
    %521 = arith.mulf %520, %328 : vector<1x128xf32>
    %522 = vector.broadcast %43 : f32 to vector<1x128xf32>
    %523 = arith.mulf %522, %329 : vector<1x128xf32>
    %524 = arith.addf %521, %523 : vector<1x128xf32>
    %525 = arith.addf %509, %514 : vector<1x128xf32>
    %526 = arith.addf %519, %524 : vector<1x128xf32>
    %527 = arith.addf %525, %526 : vector<1x128xf32>
    %528 = vector.broadcast %79 : f32 to vector<1x128xf32>
    %529 = arith.addf %527, %528 : vector<1x128xf32>
    %530 = math.tanh %529 : vector<1x128xf32>
    %531 = vector.broadcast %36 : f32 to vector<1x128xf32>
    %532 = arith.mulf %531, %320 : vector<1x128xf32>
    %533 = vector.broadcast %37 : f32 to vector<1x128xf32>
    %534 = arith.mulf %533, %321 : vector<1x128xf32>
    %535 = arith.addf %532, %534 : vector<1x128xf32>
    %536 = vector.broadcast %38 : f32 to vector<1x128xf32>
    %537 = arith.mulf %536, %323 : vector<1x128xf32>
    %538 = vector.broadcast %39 : f32 to vector<1x128xf32>
    %539 = arith.mulf %538, %324 : vector<1x128xf32>
    %540 = arith.addf %537, %539 : vector<1x128xf32>
    %541 = vector.broadcast %40 : f32 to vector<1x128xf32>
    %542 = arith.mulf %541, %326 : vector<1x128xf32>
    %543 = vector.broadcast %41 : f32 to vector<1x128xf32>
    %544 = arith.mulf %543, %327 : vector<1x128xf32>
    %545 = arith.addf %542, %544 : vector<1x128xf32>
    %546 = vector.broadcast %42 : f32 to vector<1x128xf32>
    %547 = arith.mulf %546, %329 : vector<1x128xf32>
    %548 = vector.broadcast %43 : f32 to vector<1x128xf32>
    %549 = arith.mulf %548, %330 : vector<1x128xf32>
    %550 = arith.addf %547, %549 : vector<1x128xf32>
    %551 = arith.addf %535, %540 : vector<1x128xf32>
    %552 = arith.addf %545, %550 : vector<1x128xf32>
    %553 = arith.addf %551, %552 : vector<1x128xf32>
    %554 = vector.broadcast %79 : f32 to vector<1x128xf32>
    %555 = arith.addf %553, %554 : vector<1x128xf32>
    %556 = math.tanh %555 : vector<1x128xf32>
    %557 = arith.addf %530, %556 : vector<1x128xf32>
    %cst_47 = arith.constant 5.000000e-01 : f32
    %558 = vector.broadcast %cst_47 : f32 to vector<1x128xf32>
    %559 = arith.mulf %558, %557 : vector<1x128xf32>
    %c4_48 = arith.constant 4 : index
    %c0_49 = arith.constant 0 : index
    %c0_50 = arith.constant 0 : index
    %560 = vector.load %arg3[%c4_48, %c0_49, %c0_50] : memref<9x1x128xf32, #tpu.memory_space<vmem>>, vector<1x1x128xf32>
    %561 = vector.shape_cast %560 : vector<1x1x128xf32> to vector<1x128xf32>
    %562 = vector.shape_cast %559 : vector<1x128xf32> to vector<1x1x128xf32>
    tpu.vector_store %arg3[%c4_48, %c0_49, %c0_50], %562 {strides = array<i32>} : memref<9x1x128xf32, #tpu.memory_space<vmem>>, vector<1x1x128xf32>,
    %563 = vector.broadcast %44 : f32 to vector<1x128xf32>
    %564 = arith.mulf %563, %319 : vector<1x128xf32>
    %565 = vector.broadcast %45 : f32 to vector<1x128xf32>
    %566 = arith.mulf %565, %320 : vector<1x128xf32>
    %567 = arith.addf %564, %566 : vector<1x128xf32>
    %568 = vector.broadcast %46 : f32 to vector<1x128xf32>
    %569 = arith.mulf %568, %322 : vector<1x128xf32>
    %570 = vector.broadcast %47 : f32 to vector<1x128xf32>
    %571 = arith.mulf %570, %323 : vector<1x128xf32>
    %572 = arith.addf %569, %571 : vector<1x128xf32>
    %573 = vector.broadcast %48 : f32 to vector<1x128xf32>
    %574 = arith.mulf %573, %325 : vector<1x128xf32>
    %575 = vector.broadcast %49 : f32 to vector<1x128xf32>
    %576 = arith.mulf %575, %326 : vector<1x128xf32>
    %577 = arith.addf %574, %576 : vector<1x128xf32>
    %578 = vector.broadcast %50 : f32 to vector<1x128xf32>
    %579 = arith.mulf %578, %328 : vector<1x128xf32>
    %580 = vector.broadcast %51 : f32 to vector<1x128xf32>
    %581 = arith.mulf %580, %329 : vector<1x128xf32>
    %582 = arith.addf %579, %581 : vector<1x128xf32>
    %583 = arith.addf %567, %572 : vector<1x128xf32>
    %584 = arith.addf %577, %582 : vector<1x128xf32>
    %585 = arith.addf %583, %584 : vector<1x128xf32>
    %586 = vector.broadcast %80 : f32 to vector<1x128xf32>
    %587 = arith.addf %585, %586 : vector<1x128xf32>
    %588 = math.tanh %587 : vector<1x128xf32>
    %589 = vector.broadcast %44 : f32 to vector<1x128xf32>
    %590 = arith.mulf %589, %320 : vector<1x128xf32>
    %591 = vector.broadcast %45 : f32 to vector<1x128xf32>
    %592 = arith.mulf %591, %321 : vector<1x128xf32>
    %593 = arith.addf %590, %592 : vector<1x128xf32>
    %594 = vector.broadcast %46 : f32 to vector<1x128xf32>
    %595 = arith.mulf %594, %323 : vector<1x128xf32>
    %596 = vector.broadcast %47 : f32 to vector<1x128xf32>
    %597 = arith.mulf %596, %324 : vector<1x128xf32>
    %598 = arith.addf %595, %597 : vector<1x128xf32>
    %599 = vector.broadcast %48 : f32 to vector<1x128xf32>
    %600 = arith.mulf %599, %326 : vector<1x128xf32>
    %601 = vector.broadcast %49 : f32 to vector<1x128xf32>
    %602 = arith.mulf %601, %327 : vector<1x128xf32>
    %603 = arith.addf %600, %602 : vector<1x128xf32>
    %604 = vector.broadcast %50 : f32 to vector<1x128xf32>
    %605 = arith.mulf %604, %329 : vector<1x128xf32>
    %606 = vector.broadcast %51 : f32 to vector<1x128xf32>
    %607 = arith.mulf %606, %330 : vector<1x128xf32>
    %608 = arith.addf %605, %607 : vector<1x128xf32>
    %609 = arith.addf %593, %598 : vector<1x128xf32>
    %610 = arith.addf %603, %608 : vector<1x128xf32>
    %611 = arith.addf %609, %610 : vector<1x128xf32>
    %612 = vector.broadcast %80 : f32 to vector<1x128xf32>
    %613 = arith.addf %611, %612 : vector<1x128xf32>
    %614 = math.tanh %613 : vector<1x128xf32>
    %615 = arith.addf %588, %614 : vector<1x128xf32>
    %cst_51 = arith.constant 5.000000e-01 : f32
    %616 = vector.broadcast %cst_51 : f32 to vector<1x128xf32>
    %617 = arith.mulf %616, %615 : vector<1x128xf32>
    %c5_52 = arith.constant 5 : index
    %c0_53 = arith.constant 0 : index
    %c0_54 = arith.constant 0 : index
    %618 = vector.load %arg3[%c5_52, %c0_53, %c0_54] : memref<9x1x128xf32, #tpu.memory_space<vmem>>, vector<1x1x128xf32>
    %619 = vector.shape_cast %618 : vector<1x1x128xf32> to vector<1x128xf32>
    %620 = vector.shape_cast %617 : vector<1x128xf32> to vector<1x1x128xf32>
    tpu.vector_store %arg3[%c5_52, %c0_53, %c0_54], %620 {strides = array<i32>} : memref<9x1x128xf32, #tpu.memory_space<vmem>>, vector<1x1x128xf32>,
    %621 = vector.broadcast %52 : f32 to vector<1x128xf32>
    %622 = arith.mulf %621, %319 : vector<1x128xf32>
    %623 = vector.broadcast %53 : f32 to vector<1x128xf32>
    %624 = arith.mulf %623, %320 : vector<1x128xf32>
    %625 = arith.addf %622, %624 : vector<1x128xf32>
    %626 = vector.broadcast %54 : f32 to vector<1x128xf32>
    %627 = arith.mulf %626, %322 : vector<1x128xf32>
    %628 = vector.broadcast %55 : f32 to vector<1x128xf32>
    %629 = arith.mulf %628, %323 : vector<1x128xf32>
    %630 = arith.addf %627, %629 : vector<1x128xf32>
    %631 = vector.broadcast %56 : f32 to vector<1x128xf32>
    %632 = arith.mulf %631, %325 : vector<1x128xf32>
    %633 = vector.broadcast %57 : f32 to vector<1x128xf32>
    %634 = arith.mulf %633, %326 : vector<1x128xf32>
    %635 = arith.addf %632, %634 : vector<1x128xf32>
    %636 = vector.broadcast %58 : f32 to vector<1x128xf32>
    %637 = arith.mulf %636, %328 : vector<1x128xf32>
    %638 = vector.broadcast %59 : f32 to vector<1x128xf32>
    %639 = arith.mulf %638, %329 : vector<1x128xf32>
    %640 = arith.addf %637, %639 : vector<1x128xf32>
    %641 = arith.addf %625, %630 : vector<1x128xf32>
    %642 = arith.addf %635, %640 : vector<1x128xf32>
    %643 = arith.addf %641, %642 : vector<1x128xf32>
    %644 = vector.broadcast %81 : f32 to vector<1x128xf32>
    %645 = arith.addf %643, %644 : vector<1x128xf32>
    %646 = math.tanh %645 : vector<1x128xf32>
    %647 = vector.broadcast %52 : f32 to vector<1x128xf32>
    %648 = arith.mulf %647, %320 : vector<1x128xf32>
    %649 = vector.broadcast %53 : f32 to vector<1x128xf32>
    %650 = arith.mulf %649, %321 : vector<1x128xf32>
    %651 = arith.addf %648, %650 : vector<1x128xf32>
    %652 = vector.broadcast %54 : f32 to vector<1x128xf32>
    %653 = arith.mulf %652, %323 : vector<1x128xf32>
    %654 = vector.broadcast %55 : f32 to vector<1x128xf32>
    %655 = arith.mulf %654, %324 : vector<1x128xf32>
    %656 = arith.addf %653, %655 : vector<1x128xf32>
    %657 = vector.broadcast %56 : f32 to vector<1x128xf32>
    %658 = arith.mulf %657, %326 : vector<1x128xf32>
    %659 = vector.broadcast %57 : f32 to vector<1x128xf32>
    %660 = arith.mulf %659, %327 : vector<1x128xf32>
    %661 = arith.addf %658, %660 : vector<1x128xf32>
    %662 = vector.broadcast %58 : f32 to vector<1x128xf32>
    %663 = arith.mulf %662, %329 : vector<1x128xf32>
    %664 = vector.broadcast %59 : f32 to vector<1x128xf32>
    %665 = arith.mulf %664, %330 : vector<1x128xf32>
    %666 = arith.addf %663, %665 : vector<1x128xf32>
    %667 = arith.addf %651, %656 : vector<1x128xf32>
    %668 = arith.addf %661, %666 : vector<1x128xf32>
    %669 = arith.addf %667, %668 : vector<1x128xf32>
    %670 = vector.broadcast %81 : f32 to vector<1x128xf32>
    %671 = arith.addf %669, %670 : vector<1x128xf32>
    %672 = math.tanh %671 : vector<1x128xf32>
    %673 = arith.addf %646, %672 : vector<1x128xf32>
    %cst_55 = arith.constant 5.000000e-01 : f32
    %674 = vector.broadcast %cst_55 : f32 to vector<1x128xf32>
    %675 = arith.mulf %674, %673 : vector<1x128xf32>
    %c6_56 = arith.constant 6 : index
    %c0_57 = arith.constant 0 : index
    %c0_58 = arith.constant 0 : index
    %676 = vector.load %arg3[%c6_56, %c0_57, %c0_58] : memref<9x1x128xf32, #tpu.memory_space<vmem>>, vector<1x1x128xf32>
    %677 = vector.shape_cast %676 : vector<1x1x128xf32> to vector<1x128xf32>
    %678 = vector.shape_cast %675 : vector<1x128xf32> to vector<1x1x128xf32>
    tpu.vector_store %arg3[%c6_56, %c0_57, %c0_58], %678 {strides = array<i32>} : memref<9x1x128xf32, #tpu.memory_space<vmem>>, vector<1x1x128xf32>,
    %679 = vector.broadcast %60 : f32 to vector<1x128xf32>
    %680 = arith.mulf %679, %319 : vector<1x128xf32>
    %681 = vector.broadcast %61 : f32 to vector<1x128xf32>
    %682 = arith.mulf %681, %320 : vector<1x128xf32>
    %683 = arith.addf %680, %682 : vector<1x128xf32>
    %684 = vector.broadcast %62 : f32 to vector<1x128xf32>
    %685 = arith.mulf %684, %322 : vector<1x128xf32>
    %686 = vector.broadcast %63 : f32 to vector<1x128xf32>
    %687 = arith.mulf %686, %323 : vector<1x128xf32>
    %688 = arith.addf %685, %687 : vector<1x128xf32>
    %689 = vector.broadcast %64 : f32 to vector<1x128xf32>
    %690 = arith.mulf %689, %325 : vector<1x128xf32>
    %691 = vector.broadcast %65 : f32 to vector<1x128xf32>
    %692 = arith.mulf %691, %326 : vector<1x128xf32>
    %693 = arith.addf %690, %692 : vector<1x128xf32>
    %694 = vector.broadcast %66 : f32 to vector<1x128xf32>
    %695 = arith.mulf %694, %328 : vector<1x128xf32>
    %696 = vector.broadcast %67 : f32 to vector<1x128xf32>
    %697 = arith.mulf %696, %329 : vector<1x128xf32>
    %698 = arith.addf %695, %697 : vector<1x128xf32>
    %699 = arith.addf %683, %688 : vector<1x128xf32>
    %700 = arith.addf %693, %698 : vector<1x128xf32>
    %701 = arith.addf %699, %700 : vector<1x128xf32>
    %702 = vector.broadcast %82 : f32 to vector<1x128xf32>
    %703 = arith.addf %701, %702 : vector<1x128xf32>
    %704 = math.tanh %703 : vector<1x128xf32>
    %705 = vector.broadcast %60 : f32 to vector<1x128xf32>
    %706 = arith.mulf %705, %320 : vector<1x128xf32>
    %707 = vector.broadcast %61 : f32 to vector<1x128xf32>
    %708 = arith.mulf %707, %321 : vector<1x128xf32>
    %709 = arith.addf %706, %708 : vector<1x128xf32>
    %710 = vector.broadcast %62 : f32 to vector<1x128xf32>
    %711 = arith.mulf %710, %323 : vector<1x128xf32>
    %712 = vector.broadcast %63 : f32 to vector<1x128xf32>
    %713 = arith.mulf %712, %324 : vector<1x128xf32>
    %714 = arith.addf %711, %713 : vector<1x128xf32>
    %715 = vector.broadcast %64 : f32 to vector<1x128xf32>
    %716 = arith.mulf %715, %326 : vector<1x128xf32>
    %717 = vector.broadcast %65 : f32 to vector<1x128xf32>
    %718 = arith.mulf %717, %327 : vector<1x128xf32>
    %719 = arith.addf %716, %718 : vector<1x128xf32>
    %720 = vector.broadcast %66 : f32 to vector<1x128xf32>
    %721 = arith.mulf %720, %329 : vector<1x128xf32>
    %722 = vector.broadcast %67 : f32 to vector<1x128xf32>
    %723 = arith.mulf %722, %330 : vector<1x128xf32>
    %724 = arith.addf %721, %723 : vector<1x128xf32>
    %725 = arith.addf %709, %714 : vector<1x128xf32>
    %726 = arith.addf %719, %724 : vector<1x128xf32>
    %727 = arith.addf %725, %726 : vector<1x128xf32>
    %728 = vector.broadcast %82 : f32 to vector<1x128xf32>
    %729 = arith.addf %727, %728 : vector<1x128xf32>
    %730 = math.tanh %729 : vector<1x128xf32>
    %731 = arith.addf %704, %730 : vector<1x128xf32>
    %cst_59 = arith.constant 5.000000e-01 : f32
    %732 = vector.broadcast %cst_59 : f32 to vector<1x128xf32>
    %733 = arith.mulf %732, %731 : vector<1x128xf32>
    %c7_60 = arith.constant 7 : index
    %c0_61 = arith.constant 0 : index
    %c0_62 = arith.constant 0 : index
    %734 = vector.load %arg3[%c7_60, %c0_61, %c0_62] : memref<9x1x128xf32, #tpu.memory_space<vmem>>, vector<1x1x128xf32>
    %735 = vector.shape_cast %734 : vector<1x1x128xf32> to vector<1x128xf32>
    %736 = vector.shape_cast %733 : vector<1x128xf32> to vector<1x1x128xf32>
    tpu.vector_store %arg3[%c7_60, %c0_61, %c0_62], %736 {strides = array<i32>} : memref<9x1x128xf32, #tpu.memory_space<vmem>>, vector<1x1x128xf32>,
    %737 = vector.broadcast %68 : f32 to vector<1x128xf32>
    %738 = arith.mulf %737, %319 : vector<1x128xf32>
    %739 = vector.broadcast %69 : f32 to vector<1x128xf32>
    %740 = arith.mulf %739, %320 : vector<1x128xf32>
    %741 = arith.addf %738, %740 : vector<1x128xf32>
    %742 = vector.broadcast %70 : f32 to vector<1x128xf32>
    %743 = arith.mulf %742, %322 : vector<1x128xf32>
    %744 = vector.broadcast %71 : f32 to vector<1x128xf32>
    %745 = arith.mulf %744, %323 : vector<1x128xf32>
    %746 = arith.addf %743, %745 : vector<1x128xf32>
    %747 = vector.broadcast %72 : f32 to vector<1x128xf32>
    %748 = arith.mulf %747, %325 : vector<1x128xf32>
    %749 = vector.broadcast %73 : f32 to vector<1x128xf32>
    %750 = arith.mulf %749, %326 : vector<1x128xf32>
    %751 = arith.addf %748, %750 : vector<1x128xf32>
    %752 = vector.broadcast %74 : f32 to vector<1x128xf32>
    %753 = arith.mulf %752, %328 : vector<1x128xf32>
    %754 = vector.broadcast %75 : f32 to vector<1x128xf32>
    %755 = arith.mulf %754, %329 : vector<1x128xf32>
    %756 = arith.addf %753, %755 : vector<1x128xf32>
    %757 = arith.addf %741, %746 : vector<1x128xf32>
    %758 = arith.addf %751, %756 : vector<1x128xf32>
    %759 = arith.addf %757, %758 : vector<1x128xf32>
    %760 = vector.broadcast %83 : f32 to vector<1x128xf32>
    %761 = arith.addf %759, %760 : vector<1x128xf32>
    %762 = math.tanh %761 : vector<1x128xf32>
    %763 = vector.broadcast %68 : f32 to vector<1x128xf32>
    %764 = arith.mulf %763, %320 : vector<1x128xf32>
    %765 = vector.broadcast %69 : f32 to vector<1x128xf32>
    %766 = arith.mulf %765, %321 : vector<1x128xf32>
    %767 = arith.addf %764, %766 : vector<1x128xf32>
    %768 = vector.broadcast %70 : f32 to vector<1x128xf32>
    %769 = arith.mulf %768, %323 : vector<1x128xf32>
    %770 = vector.broadcast %71 : f32 to vector<1x128xf32>
    %771 = arith.mulf %770, %324 : vector<1x128xf32>
    %772 = arith.addf %769, %771 : vector<1x128xf32>
    %773 = vector.broadcast %72 : f32 to vector<1x128xf32>
    %774 = arith.mulf %773, %326 : vector<1x128xf32>
    %775 = vector.broadcast %73 : f32 to vector<1x128xf32>
    %776 = arith.mulf %775, %327 : vector<1x128xf32>
    %777 = arith.addf %774, %776 : vector<1x128xf32>
    %778 = vector.broadcast %74 : f32 to vector<1x128xf32>
    %779 = arith.mulf %778, %329 : vector<1x128xf32>
    %780 = vector.broadcast %75 : f32 to vector<1x128xf32>
    %781 = arith.mulf %780, %330 : vector<1x128xf32>
    %782 = arith.addf %779, %781 : vector<1x128xf32>
    %783 = arith.addf %767, %772 : vector<1x128xf32>
    %784 = arith.addf %777, %782 : vector<1x128xf32>
    %785 = arith.addf %783, %784 : vector<1x128xf32>
    %786 = vector.broadcast %83 : f32 to vector<1x128xf32>
    %787 = arith.addf %785, %786 : vector<1x128xf32>
    %788 = math.tanh %787 : vector<1x128xf32>
    %789 = arith.addf %762, %788 : vector<1x128xf32>
    %cst_63 = arith.constant 5.000000e-01 : f32
    %790 = vector.broadcast %cst_63 : f32 to vector<1x128xf32>
    %791 = arith.mulf %790, %789 : vector<1x128xf32>
    %c8_64 = arith.constant 8 : index
    %c0_65 = arith.constant 0 : index
    %c0_66 = arith.constant 0 : index
    %792 = vector.load %arg3[%c8_64, %c0_65, %c0_66] : memref<9x1x128xf32, #tpu.memory_space<vmem>>, vector<1x1x128xf32>
    %793 = vector.shape_cast %792 : vector<1x1x128xf32> to vector<1x128xf32>
    %794 = vector.shape_cast %791 : vector<1x128xf32> to vector<1x1x128xf32>
    tpu.vector_store %arg3[%c8_64, %c0_65, %c0_66], %794 {strides = array<i32>} : memref<9x1x128xf32, #tpu.memory_space<vmem>>, vector<1x1x128xf32>,
    return
  }
  func.func @transform_0(%arg0: i32) -> i32 {
    %c0_i32 = arith.constant 0 : i32
    %c0_i32_0 = arith.constant 0 : i32
    return %c0_i32 : i32
  }
  func.func @transform_1(%arg0: i32) -> (i32, i32, i32) {
    %c0_i32 = arith.constant 0 : i32
    %c0_i32_0 = arith.constant 0 : i32
    %c0_i32_1 = arith.constant 0 : i32
    return %c0_i32, %arg0, %c0_i32_0 : i32, i32, i32
  }
  func.func @transform_2(%arg0: i32) -> (i32, i32, i32) {
    %c0_i32 = arith.constant 0 : i32
    %c0_i32_0 = arith.constant 0 : i32
    %c0_i32_1 = arith.constant 0 : i32
    return %c0_i32, %arg0, %c0_i32_0 : i32, i32, i32
  }
}

</mosaic_0001>

<bundles_post_ra>
// kernel: tpu_custom_call.1
= control target key start
LH: loop header
LB: loop body
LE: loop exit
PB: predicated region body
PF: predicated region fallthrough
CT: control target
= control target key end

     0   :  { %7 = vsyncpa [#allocation5], 0  ;;  %s1484_s0 = inlined_call_operand.hbm [shape: f32[89], index: 0, kind: input, shape index: {}]   ;;  %s1485_s1 = inlined_call_operand.hbm [shape: f32[11,1,128], index: 1, kind: input, shape index: {}]   ;;  %s1486_s2 = inlined_call_operand.hbm [shape: f32[9,1,128], index: 2, kind: output, shape index: {}]  }
   0x1   :  { %8 = vsyncpa [#allocation3], 0 }
   0x2   :  { %9 = vsyncpa [#allocation4], 0  ;;  %s872_s11 = scalar_lea.hbm %s1484_s0, 16 }
   0x3   :  { %p873_p0 = scmp.ne.s32.totalorder %s1484_s0, %s872_s11  ;;  %p876_p1 = scmp.lt.u32.totalorder %s872_s11, %s1484_s0 }
   0x5   :  { %p878_p2 = pnand %p876_p1, %p873_p0 }
   0x7   :  { %881 = shalt.err (!%p878_p2)
}
   0x8   :  { %s932_s16 = smov [#allocation2]   ;;  %s933_s19 = smov [#allocation6]  }
   0x9   :  { %17 = dma.hbm_to_smem %s1484_s0, 16, %s932_s16, [#allocation5]  }
   0xa   :  { %s23_s20 = sshll.u32 %s933_s19, 4  ;;  %s882_s23 = scalar_lea.hbm %s1485_s1, 176  ;;  %s24_s20 = int_to_ptr.vmem [resolvable:$true] %s23_s20 }
   0xb   :  { %p883_p3 = scmp.ne.s32.totalorder %s1485_s1, %s882_s23  ;;  %p886_p4 = scmp.lt.u32.totalorder %s882_s23, %s1485_s1 }
   0xd   :  { %p888_p5 = pnand %p886_p4, %p883_p3 }
   0xf   :  { %891 = shalt.err (!%p888_p5)
}
  0x10   :  { %s892_s28 = scalar_lea.vmem %s24_s20, 176  ;;  %s896_s0 = scalar_lea.vmem %s24_s20, 192 }
  0x11   :  { %p893_p6 = scmp.ne.s32.totalorder %s24_s20, %s892_s28  ;;  %p897_p7 = scmp.lt.s32.totalorder %s24_s20, %s24_s20 }
  0x12   :  { %p898_p8 = scmp.lt.s32.totalorder %s896_s0, %s892_s28 }
  0x14   :  { %p899_p9 = por %p898_p8, %p897_p7 }
  0x16   :  { %p900_p10 = pnand %p899_p9, %p893_p6 }
  0x18   :  { %903 = shalt.err (!%p900_p10)
}
  0x19   :  { %s934_s29 = smov 16   ;;  %s935_s30 = smov 1  }
  0x1a   :  { %29 = dma.hbm_to_vmem [thread:$0]  %s1485_s1, 176, %s24_s20, [#allocation3], %s934_s29, %s934_s29, %s935_s30  }
  0x1b   :  { %926 = dma.done.wait [#allocation5], 16  }
  0x1c   :  { %927 = vsyncadd [#allocation5], 4294967280 }
  0x1d   :  { %928 = dma.done.wait [#allocation3], 176  }
  0x1e   :  { %929 = vsyncadd [#allocation3], 4294967120 }
  0x1f   :  { %36 = sfence }
  0x20   :  { %s782_s5 = sld [smem:[#allocation2 + $0x54]]  ;;  %s783_s6 = sld [smem:[#allocation2 + $0x55]]  ;;  %v126_v0 = vld [vmem:[#allocation6] sm:$0x1]  ;;  %v130_v1 = vld [vmem:[#allocation6 + $0x8] sm:$0x1] }
  0x21   :  { %s784_s7 = sld [smem:[#allocation2 + $0x56]]  ;;  %s785_s8 = sld [smem:[#allocation2 + $0x57]]  ;;  %v135_v2 = vld [vmem:[#allocation6 + $0x9] sm:$0x1]  ;;  %v139_v3 = vld [vmem:[#allocation6 + $0xa] sm:$0x1] }
  0x22   :  { %s979_s9 = sld [smem:[#allocation2 + $0x58]]  ;;  %s699_s11 = sld [smem:[#allocation2 + $0x1]]  ;;  %v981_v6 = vld [vmem:[#allocation6 + $0x1] sm:$0x1]  ;;  %v985_v11 = vld [vmem:[#allocation6 + $0x2] sm:$0x1] }
  0x23   :  { %s37_s10 = sld [smem:[#allocation2]]  ;;  %s983_s1 = sld [smem:[#allocation2 + $0x2]]  ;;  %v989_v14 = vld [vmem:[#allocation6 + $0x3] sm:$0x1]  ;;  %v991_v15 = vld [vmem:[#allocation6 + $0x4] sm:$0x1] }
  0x24   :  { %s706_s12 = sld [smem:[#allocation2 + $0x8]]  ;;  %s987_s13 = sld [smem:[#allocation2 + $0x3]]  ;;  %v994_v18 = vld [vmem:[#allocation6 + $0x5] sm:$0x1]  ;;  %v998_v22 = vld [vmem:[#allocation6 + $0x6] sm:$0x1] }
  0x25   :  { %s996_s14 = sld [smem:[#allocation2 + $0x9]]  ;;  %v1007_v31 = vld [vmem:[#allocation6 + $0x7] sm:$0x1]  ;;  %s1013_s15 = sld [smem:[#allocation2 + $0x4]] }
  0x26   :  { %v127_v4 = vstv %s782_s5  ;;  %v131_v5 = vstv %s783_s6  ;;  %s1018_s16 = sld [smem:[#allocation2 + $0x5]]  ;;  %s1021_s17 = sld [smem:[#allocation2 + $0xa]] }
  0x27   :  { %v128_v7 = vmul.f32 %v127_v4, %v126_v0  ;;  %v132_v8 = vmul.f32 %v131_v5, %v130_v1  ;;  %v136_v9 = vstv %s784_s7  ;;  %v140_v10 = vstv %s785_s8  ;;  %s1036_s18 = sld [smem:[#allocation2 + $0x6]]  ;;  %s1042_s19 = sld [smem:[#allocation2 + $0x7]] }
  0x28   :  { %v137_v12 = vmul.f32 %v136_v9, %v135_v2  ;;  %v141_v13 = vmul.f32 %v140_v10, %v139_v3  ;;  %v143_v17 = vstv %s979_s9  ;;  %v163_v20 = vstv %s699_s11  ;;  %s1044_s20 = sld [smem:[#allocation2 + $0xb]]  ;;  %s1074_s21 = sld [smem:[#allocation2 + $0xc]] }
  0x29   :  { %v133_v16 = vadd.f32 %v132_v8, %v128_v7  ;;  %v161_v19 = vstv %s37_s10  ;;  %v164_v24 = vmul.f32 %v163_v20, %v985_v11  ;;  %v170_v26 = vmul.f32 %v163_v20, %v989_v14  ;;  %s1076_s22 = sld [smem:[#allocation2 + $0xd]]  ;;  %s1081_s23 = sld [smem:[#allocation2 + $0xe]] }
  0x2a   :  { %v142_v21 = vadd.f32 %v141_v13, %v137_v12  ;;  %v162_v23 = vmul.f32 %v161_v19, %v981_v6  ;;  %v169_v25 = vmul.f32 %v161_v19, %v985_v11  ;;  %v174_v27 = vmul.f32 %v161_v19, %v989_v14  ;;  %s1085_s24 = sld [smem:[#allocation2 + $0xf]]  ;;  %s1089_s25 = sld [smem:[#allocation2 + $0x10]] }
  0x2b   :  { %v175_v28 = vmul.f32 %v163_v20, %v991_v15  ;;  %v179_v29 = vmul.f32 %v161_v19, %v991_v15  ;;  %v180_v33 = vmul.f32 %v163_v20, %v994_v18  ;;  %v184_v34 = vmul.f32 %v161_v19, %v994_v18  ;;  %s1091_s26 = sld [smem:[#allocation2 + $0x11]]  ;;  %s1095_s27 = sld [smem:[#allocation2 + $0x12]] }
  0x2c   :  { %v144_v30 = vadd.f32 %v143_v17, %v142_v21  ;;  %v165_v32 = vadd.f32 %v164_v24, %v162_v23  ;;  %v166_v35 = vstv %s706_s12  ;;  %v171_v36 = vadd.f32 %v170_v26, %v169_v25  ;;  %s1101_s28 = sld [smem:[#allocation2 + $0x13]]  ;;  %s1103_s0 = sld [smem:[#allocation2 + $0x4c]] }
  0x2d   :  { %v176_v37 = vadd.f32 %v175_v28, %v174_v27  ;;  %v185_v38 = vmul.f32 %v163_v20, %v998_v22  ;;  %v181_v41 = vadd.f32 %v180_v33, %v179_v29  ;;  %v189_v42 = vmul.f32 %v161_v19, %v998_v22  ;;  %s1119_s3 = sld [smem:[#allocation2 + $0x14]]  ;;  %s1125_s4 = sld [smem:[#allocation2 + $0x15]] }
  0x2e   :  { %v145_v39 = vadd.f32 %v144_v30, %v133_v16  ;;  %v167_v40 = vadd.f32 %v166_v35, %v165_v32  ;;  %v172_v43 = vadd.f32 %v171_v36, %v166_v35  ;;  %v190_v46 = vmul.f32 %v163_v20, %v1007_v31  ;;  %s1130_s5 = sld [smem:[#allocation2 + $0x16]]  ;;  %s1136_s6 = sld [smem:[#allocation2 + $0x17]] }
  0x2f   :  { %v177_v44 = vadd.f32 %v176_v37, %v166_v35  ;;  %v186_v45 = vadd.f32 %v185_v38, %v184_v34  ;;  %v182_v47 = vadd.f32 %v181_v41, %v166_v35  ;;  %v194_v48 = vstv %s983_s1  ;;  %s1138_s7 = sld [smem:[#allocation2 + $0x18]]  ;;  %s1143_s8 = sld [smem:[#allocation2 + $0x19]] }
  0x30   :  { %146 = vst [vmem:[#allocation7] sm:$0x1] %v145_v39  ;;  %792 = vtanh.f32 %v167_v40  ;;  %v196_v49 = vstv %s987_s13  ;;  %v191_v51 = vadd.f32 %v190_v46, %v189_v42  ;;  %v195_v52 = vmul.f32 %v194_v48, %v981_v6  ;;  %s1150_s9 = sld [smem:[#allocation2 + $0x1a]]  ;;  %s1152_s10 = sld [smem:[#allocation2 + $0x1b]] }
  0x31   :  { %794 = vtanh.f32 %v172_v43  ;;  %v187_v50 = vadd.f32 %v186_v45, %v166_v35  ;;  %v197_v53 = vmul.f32 %v196_v49, %v985_v11  ;;  %v199_v54 = vstv %s996_s14  ;;  %s1160_s11 = sld [smem:[#allocation2 + $0x4d]]  ;;  %s1182_s1 = sld [smem:[#allocation2 + $0x1c]] }
  0x32   :  { %796 = vtanh.f32 %v177_v44  ;;  %v202_v55 = vmul.f32 %v194_v48, %v985_v11  ;;  %v192_v56 = vadd.f32 %v191_v51, %v166_v35  ;;  %v203_v57 = vmul.f32 %v196_v49, %v989_v14  ;;  %s1184_s12 = sld [smem:[#allocation2 + $0x1d]]  ;;  %s1194_s13 = sld [smem:[#allocation2 + $0x1e]] }
  0x33   :  { %798 = vtanh.f32 %v182_v47  ;;  %v207_v58 = vmul.f32 %v194_v48, %v989_v14  ;;  %v198_v59 = vadd.f32 %v197_v53, %v195_v52  ;;  %v208_v60 = vmul.f32 %v196_v49, %v991_v15  ;;  %s1200_s14 = sld [smem:[#allocation2 + $0x1f]] }
  0x34   :  { %800 = vtanh.f32 %v187_v50  ;;  %v212_v61 = vmul.f32 %v194_v48, %v991_v15  ;;  %v204_v62 = vadd.f32 %v203_v57, %v202_v55  ;;  %v213_v63 = vmul.f32 %v196_v49, %v994_v18 }
  0x35   :  { %802 = vtanh.f32 %v192_v56  ;;  %v217_v0 = vmul.f32 %v194_v48, %v994_v18  ;;  %v200_v1 = vadd.f32 %v199_v54, %v198_v59  ;;  %v209_v2 = vadd.f32 %v208_v60, %v207_v58 }
  0x36   :  { %v218_v3 = vmul.f32 %v196_v49, %v998_v22  ;;  %v222_v4 = vmul.f32 %v194_v48, %v998_v22  ;;  %v205_v5 = vadd.f32 %v204_v62, %v199_v54  ;;  %v214_v7 = vadd.f32 %v213_v63, %v212_v61 }
  0x37   :  { %v223_v8 = vmul.f32 %v196_v49, %v1007_v31  ;;  %v227_v9 = vstv %s1013_s15  ;;  %804 = vtanh.f32 %v200_v1  ;;  %v210_v10 = vadd.f32 %v209_v2, %v199_v54  ;;  %s1202_s15 = sld [smem:[#allocation2 + $0x20]] }
  0x38   :  { %v219_v12 = vadd.f32 %v218_v3, %v217_v0  ;;  %v228_v13 = vmul.f32 %v227_v9, %v981_v6  ;;  %806 = vtanh.f32 %v205_v5  ;;  %v215_v16 = vadd.f32 %v214_v7, %v199_v54 }
  0x39   :  { %v224_v17 = vadd.f32 %v223_v8, %v222_v4  ;;  %v229_v19 = vstv %s1018_s16  ;;  %808 = vtanh.f32 %v210_v10  ;;  %v232_v24 = vstv %s1021_s17  ;;  %s1206_s16 = sld [smem:[#allocation2 + $0x21]]  ;;  %s1208_s17 = sld [smem:[#allocation2 + $0x22]] }
  0x3a   :  { %v1040_v20 = vpop.eup %792  ;;  %v220_v21 = vadd.f32 %v219_v12, %v199_v54  ;;  %v230_v23 = vmul.f32 %v229_v19, %v985_v11  ;;  %810 = vtanh.f32 %v215_v16  ;;  %v235_v27 = vmul.f32 %v227_v9, %v985_v11 }
  0x3b   :  { %v1048_v25 = vpop.eup %794  ;;  %v225_v26 = vadd.f32 %v224_v17, %v199_v54  ;;  %v236_v28 = vmul.f32 %v229_v19, %v989_v14  ;;  %v240_v32 = vmul.f32 %v227_v9, %v989_v14  ;;  %v241_v33 = vmul.f32 %v229_v19, %v991_v15 }
  0x3c   :  { %v1052_v29 = vpop.eup %796  ;;  %812 = vtanh.f32 %v220_v21  ;;  %v231_v30 = vadd.f32 %v230_v23, %v228_v13  ;;  %v245_v36 = vmul.f32 %v227_v9, %v991_v15  ;;  %v246_v37 = vmul.f32 %v229_v19, %v994_v18 }
  0x3d   :  { %v1056_v34 = vpop.eup %798  ;;  %814 = vtanh.f32 %v225_v26  ;;  %v237_v35 = vadd.f32 %v236_v28, %v235_v27  ;;  %v242_v40 = vadd.f32 %v241_v33, %v240_v32  ;;  %v250_v41 = vmul.f32 %v227_v9, %v994_v18 }
  0x3e   :  { %v1060_v38 = vpop.eup %800  ;;  %v233_v39 = vadd.f32 %v232_v24, %v231_v30  ;;  %v251_v42 = vmul.f32 %v229_v19, %v998_v22  ;;  %v247_v45 = vadd.f32 %v246_v37, %v245_v36  ;;  %v255_v46 = vmul.f32 %v227_v9, %v998_v22 }
  0x3f   :  { %v1064_v43 = vpop.eup %802  ;;  %v238_v44 = vadd.f32 %v237_v35, %v232_v24  ;;  %v256_v47 = vmul.f32 %v229_v19, %v1007_v31  ;;  %v243_v48 = vadd.f32 %v242_v40, %v232_v24  ;;  %v260_v50 = vstv %s1036_s18  ;;  %s1212_s18 = sld [smem:[#allocation2 + $0x23]] }
  0x40   :  { %816 = vtanh.f32 %v233_v39  ;;  %v252_v49 = vadd.f32 %v251_v42, %v250_v41  ;;  %v248_v51 = vadd.f32 %v247_v45, %v232_v24  ;;  %v261_v53 = vmul.f32 %v260_v50, %v981_v6 }
  0x41   :  { %818 = vtanh.f32 %v238_v44  ;;  %v257_v52 = vadd.f32 %v256_v47, %v255_v46  ;;  %v805_v54 = vpop.eup %804  ;;  %v262_v56 = vstv %s1042_s19  ;;  %v265_v57 = vstv %s1044_s20  ;;  %s1214_s19 = sld [smem:[#allocation2 + $0x4e]]  ;;  %s1227_s20 = sld [smem:[#allocation2 + $0x24]] }
  0x42   :  { %820 = vtanh.f32 %v243_v48  ;;  %v253_v55 = vadd.f32 %v252_v49, %v232_v24  ;;  %v807_v58 = vpop.eup %806  ;;  %v263_v60 = vmul.f32 %v262_v56, %v985_v11  ;;  %v268_v61 = vmul.f32 %v260_v50, %v985_v11 }
  0x43   :  { %822 = vtanh.f32 %v248_v51  ;;  %v258_v59 = vadd.f32 %v257_v52, %v232_v24  ;;  %v809_v62 = vpop.eup %808  ;;  %v269_v6 = vmul.f32 %v262_v56, %v989_v14  ;;  %v273_v63 = vmul.f32 %v260_v50, %v989_v14 }
  0x44   :  { %824 = vtanh.f32 %v253_v55  ;;  %v274_v0 = vmul.f32 %v262_v56, %v991_v15  ;;  %v811_v1 = vpop.eup %810  ;;  %v264_v2 = vadd.f32 %v263_v60, %v261_v53  ;;  %v278_v3 = vmul.f32 %v260_v50, %v991_v15 }
  0x45   :  { %826 = vtanh.f32 %v258_v59  ;;  %v279_v11 = vmul.f32 %v262_v56, %v994_v18  ;;  %v270_v5 = vadd.f32 %v269_v6, %v268_v61  ;;  %v283_v8 = vmul.f32 %v260_v50, %v994_v18 }
  0x46   :  { %v813_v4 = vpop.eup %812  ;;  %v275_v7 = vadd.f32 %v274_v0, %v273_v63  ;;  %v284_v14 = vmul.f32 %v262_v56, %v998_v22  ;;  %v266_v10 = vadd.f32 %v265_v57, %v264_v2  ;;  %v288_v15 = vmul.f32 %v260_v50, %v998_v22 }
  0x47   :  { %v815_v9 = vpop.eup %814  ;;  %v280_v12 = vadd.f32 %v279_v11, %v278_v3  ;;  %v289_v13 = vmul.f32 %v262_v56, %v1007_v31  ;;  %v271_v16 = vadd.f32 %v270_v5, %v265_v57  ;;  %v1099_v18 = vadd.f32 %v1048_v25, %v1040_v20 }
  0x48   :  { %v276_v17 = vadd.f32 %v275_v7, %v265_v57  ;;  %v285_v19 = vadd.f32 %v284_v14, %v283_v8  ;;  %828 = vtanh.f32 %v266_v10  ;;  %v1107_v22 = vadd.f32 %v1056_v34, %v1052_v29 }
  0x49   :  { %v281_v21 = vadd.f32 %v280_v12, %v265_v57  ;;  %v290_v23 = vadd.f32 %v289_v13, %v288_v15  ;;  %830 = vtanh.f32 %v271_v16  ;;  %v1111_v20 = vadd.f32 %v1064_v43, %v1060_v38 }
  0x4a   :  { %v817_v31 = vpop.eup %816  ;;  %v286_v24 = vadd.f32 %v285_v19, %v265_v57  ;;  %v1113_v25 = vadd.f32 %v807_v58, %v805_v54  ;;  %832 = vtanh.f32 %v276_v17  ;;  %v1115_v28 = vadd.f32 %v811_v1, %v809_v62 }
  0x4b   :  { %v819_v26 = vpop.eup %818  ;;  %v291_v27 = vadd.f32 %v290_v23, %v265_v57  ;;  %v1117_v30 = vadd.f32 %v815_v9, %v813_v4  ;;  %834 = vtanh.f32 %v281_v21  ;;  %v305_v33 = vstv %s1074_s21  ;;  %s1231_s21 = sld [smem:[#allocation2 + $0x25]] }
  0x4c   :  { %v821_v29 = vpop.eup %820  ;;  %v1121_v32 = vadd.f32 %v819_v26, %v817_v31  ;;  %v307_v34 = vstv %s1076_s22  ;;  %836 = vtanh.f32 %v286_v24  ;;  %v306_v36 = vmul.f32 %v305_v33, %v1099_v18  ;;  %s1235_s22 = sld [smem:[#allocation2 + $0x26]] }
  0x4d   :  { %v823_v35 = vpop.eup %822  ;;  %v308_v37 = vmul.f32 %v307_v34, %v1107_v22  ;;  %v310_v38 = vstv %s1081_s23  ;;  %838 = vtanh.f32 %v291_v27  ;;  %v312_v42 = vstv %s1085_s24  ;;  %s1241_s23 = sld [smem:[#allocation2 + $0x27]]  ;;  %s1243_s24 = sld [smem:[#allocation2 + $0x28]] }
  0x4e   :  { %v825_v39 = vpop.eup %824  ;;  %v1132_v40 = vadd.f32 %v823_v35, %v821_v29  ;;  %v311_v41 = vmul.f32 %v310_v38, %v1113_v25  ;;  %v313_v45 = vmul.f32 %v312_v42, %v1115_v28  ;;  %v315_v46 = vstv %s1089_s25  ;;  %s1251_s25 = sld [smem:[#allocation2 + $0x29]] }
  0x4f   :  { %v827_v43 = vpop.eup %826  ;;  %v309_v44 = vadd.f32 %v308_v37, %v306_v36  ;;  %v317_v47 = vstv %s1091_s26  ;;  %v316_v49 = vmul.f32 %v315_v46, %v1121_v32  ;;  %v320_v51 = vstv %s1095_s27  ;;  %s1253_s26 = sld [smem:[#allocation2 + $0x2a]]  ;;  %s1258_s27 = sld [smem:[#allocation2 + $0x2b]] }
  0x50   :  { %v1145_v48 = vadd.f32 %v827_v43, %v825_v39  ;;  %v318_v50 = vmul.f32 %v317_v47, %v1132_v40  ;;  %v314_v52 = vadd.f32 %v313_v45, %v311_v41  ;;  %v322_v53 = vstv %s1101_s28  ;;  %s1260_s28 = sld [smem:[#allocation2 + $0x4f]] }
  0x51   :  { %v328_v54 = vstv %s1103_s0  ;;  %v331_v55 = vmul.f32 %v305_v33, %v1107_v22  ;;  %v332_v57 = vmul.f32 %v307_v34, %v1111_v20  ;;  %v334_v58 = vmul.f32 %v310_v38, %v1115_v28  ;;  %s1274_s0 = sld [smem:[#allocation2 + $0x2c]] }
  0x52   :  { %v319_v56 = vadd.f32 %v318_v50, %v316_v49  ;;  %v335_v59 = vmul.f32 %v312_v42, %v1117_v30  ;;  %v829_v60 = vpop.eup %828  ;;  %v325_v61 = vadd.f32 %v314_v52, %v309_v44  ;;  %v337_v62 = vmul.f32 %v315_v46, %v1132_v40 }
  0x53   :  { %v338_v6 = vmul.f32 %v317_v47, %v1145_v48  ;;  %v352_v63 = vstv %s1119_s3  ;;  %v831_v0 = vpop.eup %830  ;;  %v333_v1 = vadd.f32 %v332_v57, %v331_v55  ;;  %v354_v11 = vstv %s1125_s4  ;;  %s1280_s3 = sld [smem:[#allocation2 + $0x2d]]  ;;  %s1282_s4 = sld [smem:[#allocation2 + $0x2e]] }
  0x54   :  { %v336_v2 = vadd.f32 %v335_v59, %v334_v58  ;;  %v353_v3 = vmul.f32 %v352_v63, %v1099_v18  ;;  %v833_v4 = vpop.eup %832  ;;  %v1167_v5 = vadd.f32 %v831_v0, %v829_v60  ;;  %v355_v8 = vmul.f32 %v354_v11, %v1107_v22 }
  0x55   :  { %v339_v7 = vadd.f32 %v338_v6, %v337_v62  ;;  %v357_v14 = vstv %s1130_s5  ;;  %v835_v9 = vpop.eup %834  ;;  %v359_v15 = vstv %s1136_s6  ;;  %v362_v13 = vstv %s1138_s7  ;;  %s1286_s5 = sld [smem:[#allocation2 + $0x2f]]  ;;  %s1290_s6 = sld [smem:[#allocation2 + $0x30]] }
  0x56   :  { %v343_v10 = vadd.f32 %v336_v2, %v333_v1  ;;  %v358_v12 = vmul.f32 %v357_v14, %v1113_v25  ;;  %v837_v16 = vpop.eup %836  ;;  %v1174_v17 = vadd.f32 %v835_v9, %v833_v4  ;;  %v321_v19 = vmul.f32 %v320_v51, %v1167_v5  ;;  %s1292_s7 = sld [smem:[#allocation2 + $0x31]] }
  0x57   :  { %v356_v21 = vadd.f32 %v355_v8, %v353_v3  ;;  %v360_v23 = vmul.f32 %v359_v15, %v1115_v28  ;;  %v839_v31 = vpop.eup %838  ;;  %v363_v24 = vmul.f32 %v362_v13, %v1121_v32  ;;  %v364_v26 = vstv %s1143_s8  ;;  %s1300_s8 = sld [smem:[#allocation2 + $0x32]] }
  0x58   :  { %v367_v27 = vstv %s1150_s9  ;;  %v369_v29 = vstv %s1152_s10  ;;  %v1186_v33 = vadd.f32 %v839_v31, %v837_v16  ;;  %v323_v34 = vmul.f32 %v322_v53, %v1174_v17  ;;  %s1302_s9 = sld [smem:[#allocation2 + $0x33]]  ;;  %s1308_s10 = sld [smem:[#allocation2 + $0x50]] }
  0x59   :  { %v340_v35 = vmul.f32 %v320_v51, %v1174_v17  ;;  %v361_v36 = vadd.f32 %v360_v23, %v358_v12  ;;  %v365_v37 = vmul.f32 %v364_v26, %v1132_v40  ;;  %v368_v38 = vmul.f32 %v367_v27, %v1167_v5 }
  0x5a   :  { %v370_v39 = vmul.f32 %v369_v29, %v1174_v17  ;;  %v375_v41 = vstv %s1160_s11  ;;  %v324_v42 = vadd.f32 %v323_v34, %v321_v19  ;;  %v341_v43 = vmul.f32 %v322_v53, %v1186_v33  ;;  %s1320_s11 = sld [smem:[#allocation2 + $0x34]] }
  0x5b   :  { %v372_v44 = vadd.f32 %v361_v36, %v356_v21  ;;  %v378_v45 = vmul.f32 %v352_v63, %v1107_v22  ;;  %v366_v46 = vadd.f32 %v365_v37, %v363_v24  ;;  %v379_v49 = vmul.f32 %v354_v11, %v1111_v20 }
  0x5c   :  { %v371_v47 = vadd.f32 %v370_v39, %v368_v38  ;;  %v381_v50 = vmul.f32 %v357_v14, %v1115_v28  ;;  %v326_v51 = vadd.f32 %v324_v42, %v319_v56  ;;  %v342_v52 = vadd.f32 %v341_v43, %v340_v35 }
  0x5d   :  { %v382_v55 = vmul.f32 %v359_v15, %v1117_v30  ;;  %v384_v53 = vmul.f32 %v362_v13, %v1132_v40  ;;  %v380_v58 = vadd.f32 %v379_v49, %v378_v45  ;;  %v385_v59 = vmul.f32 %v364_v26, %v1145_v48 }
  0x5e   :  { %v373_v57 = vadd.f32 %v371_v47, %v366_v46  ;;  %v387_v60 = vmul.f32 %v367_v27, %v1174_v17  ;;  %v327_v56 = vadd.f32 %v326_v51, %v325_v61  ;;  %v344_v62 = vadd.f32 %v342_v52, %v339_v7 }
  0x5f   :  { %v383_v6 = vadd.f32 %v382_v55, %v381_v50  ;;  %v388_v63 = vmul.f32 %v369_v29, %v1186_v33  ;;  %v386_v1 = vadd.f32 %v385_v59, %v384_v53  ;;  %v399_v2 = vstv %s1182_s1  ;;  %s1325_s1 = sld [smem:[#allocation2 + $0x35]] }
  0x60   :  { %v374_v0 = vadd.f32 %v373_v57, %v372_v44  ;;  %v401_v3 = vstv %s1184_s12  ;;  %v329_v11 = vadd.f32 %v328_v54, %v327_v56  ;;  %v345_v4 = vadd.f32 %v344_v62, %v343_v10  ;;  %s1327_s12 = sld [smem:[#allocation2 + $0x36]] }
  0x61   :  { %v389_v8 = vadd.f32 %v388_v63, %v387_v60  ;;  %v390_v14 = vadd.f32 %v383_v6, %v380_v58  ;;  %v400_v12 = vmul.f32 %v399_v2, %v1099_v18  ;;  %v402_v61 = vmul.f32 %v401_v3, %v1107_v22 }
  0x62   :  { %v376_v9 = vadd.f32 %v375_v41, %v374_v0  ;;  %v404_v7 = vstv %s1194_s13  ;;  %840 = vtanh.f32 %v329_v11  ;;  %v346_v15 = vadd.f32 %v345_v4, %v328_v54  ;;  %s1334_s13 = sld [smem:[#allocation2 + $0x37]] }
  0x63   :  { %v391_v13 = vadd.f32 %v389_v8, %v386_v1  ;;  %v405_v16 = vmul.f32 %v404_v7, %v1113_v25  ;;  %v403_v10 = vadd.f32 %v402_v61, %v400_v12  ;;  %v406_v19 = vstv %s1200_s14  ;;  %s1336_s14 = sld [smem:[#allocation2 + $0x38]] }
  0x64   :  { %842 = vtanh.f32 %v376_v9  ;;  %v409_v21 = vstv %s1202_s15  ;;  %v407_v31 = vmul.f32 %v406_v19, %v1115_v28  ;;  %v411_v54 = vstv %s1206_s16  ;;  %s1341_s15 = sld [smem:[#allocation2 + $0x39]]  ;;  %s1347_s16 = sld [smem:[#allocation2 + $0x3a]] }
  0x65   :  { %844 = vtanh.f32 %v346_v15  ;;  %v392_v23 = vadd.f32 %v391_v13, %v390_v14  ;;  %v410_v24 = vmul.f32 %v409_v21, %v1121_v32  ;;  %v414_v26 = vstv %s1208_s17  ;;  %s1349_s17 = sld [smem:[#allocation2 + $0x3b]] }
  0x66   :  { %v416_v27 = vstv %s1212_s18  ;;  %v422_v29 = vstv %s1214_s19  ;;  %v408_v35 = vadd.f32 %v407_v31, %v405_v16  ;;  %v412_v36 = vmul.f32 %v411_v54, %v1132_v40  ;;  %s1355_s18 = sld [smem:[#allocation2 + $0x51]]  ;;  %s1368_s19 = sld [smem:[#allocation2 + $0x3c]] }
  0x67   :  { %v393_v34 = vadd.f32 %v392_v23, %v375_v41  ;;  %v415_v37 = vmul.f32 %v414_v26, %v1167_v5  ;;  %v417_v38 = vmul.f32 %v416_v27, %v1174_v17  ;;  %v425_v39 = vmul.f32 %v399_v2, %v1107_v22 }
  0x68   :  { %v426_v42 = vmul.f32 %v401_v3, %v1111_v20  ;;  %v428_v43 = vmul.f32 %v404_v7, %v1115_v28  ;;  %v413_v41 = vadd.f32 %v412_v36, %v410_v24  ;;  %v419_v44 = vadd.f32 %v408_v35, %v403_v10 }
  0x69   :  { %846 = vtanh.f32 %v393_v34  ;;  %v429_v45 = vmul.f32 %v406_v19, %v1117_v30  ;;  %v418_v46 = vadd.f32 %v417_v38, %v415_v37  ;;  %v431_v49 = vmul.f32 %v409_v21, %v1132_v40 }
  0x6a   :  { %v427_v47 = vadd.f32 %v426_v42, %v425_v39  ;;  %v432_v50 = vmul.f32 %v411_v54, %v1145_v48  ;;  %v434_v52 = vmul.f32 %v414_v26, %v1174_v17  ;;  %v435_v55 = vmul.f32 %v416_v27, %v1186_v33 }
  0x6b   :  { %v430_v51 = vadd.f32 %v429_v45, %v428_v43  ;;  %v446_v53 = vstv %s1227_s20  ;;  %v420_v57 = vadd.f32 %v418_v46, %v413_v41  ;;  %v448_v60 = vstv %s1231_s21  ;;  %s1370_s20 = sld [smem:[#allocation2 + $0x3d]]  ;;  %s1375_s21 = sld [smem:[#allocation2 + $0x3e]] }
  0x6c   :  { %v433_v58 = vadd.f32 %v432_v50, %v431_v49  ;;  %v447_v59 = vmul.f32 %v446_v53, %v1099_v18  ;;  %v841_v56 = vpop.eup %840  ;;  %v436_v62 = vadd.f32 %v435_v55, %v434_v52  ;;  %v449_v63 = vmul.f32 %v448_v60, %v1107_v22 }
  0x6d   :  { %v437_v6 = vadd.f32 %v430_v51, %v427_v47  ;;  %v451_v0 = vstv %s1235_s22  ;;  %v421_v2 = vadd.f32 %v420_v57, %v419_v44  ;;  %v453_v11 = vstv %s1241_s23  ;;  %s1378_s22 = sld [smem:[#allocation2 + $0x3f]]  ;;  %s1380_s23 = sld [smem:[#allocation2 + $0x40]] }
  0x6e   :  { %v843_v1 = vpop.eup %842  ;;  %v452_v3 = vmul.f32 %v451_v0, %v1113_v25  ;;  %v456_v4 = vstv %s1243_s24  ;;  %v438_v14 = vadd.f32 %v436_v62, %v433_v58  ;;  %v450_v9 = vadd.f32 %v449_v63, %v447_v59  ;;  %s1387_s24 = sld [smem:[#allocation2 + $0x41]] }
  0x6f   :  { %v845_v8 = vpop.eup %844  ;;  %v454_v12 = vmul.f32 %v453_v11, %v1115_v28  ;;  %v457_v61 = vmul.f32 %v456_v4, %v1121_v32  ;;  %v423_v15 = vadd.f32 %v422_v29, %v421_v2  ;;  %v458_v13 = vstv %s1251_s25  ;;  %s1389_s25 = sld [smem:[#allocation2 + $0x42]] }
  0x70   :  { %v348_v7 = vadd.f32 %v845_v8, %v841_v56  ;;  %v461_v16 = vstv %s1253_s26  ;;  %v439_v10 = vadd.f32 %v438_v14, %v437_v6  ;;  %v459_v21 = vmul.f32 %v458_v13, %v1132_v40  ;;  %s1395_s26 = sld [smem:[#allocation2 + $0x43]] }
  0x71   :  { %v455_v19 = vadd.f32 %v454_v12, %v452_v3  ;;  %v462_v23 = vmul.f32 %v461_v16, %v1167_v5  ;;  %848 = vtanh.f32 %v423_v15  ;;  %v463_v24 = vstv %s1258_s27  ;;  %s1397_s27 = sld [smem:[#allocation2 + $0x52]] }
  0x72   :  { %v349_v31 = vmul.f32 0.5, %v348_v7  ;;  %v469_v54 = vstv %s1260_s28  ;;  %v440_v27 = vadd.f32 %v439_v10, %v422_v29  ;;  %v460_v34 = vadd.f32 %v459_v21, %v457_v61  ;;  %s1410_s28 = sld [smem:[#allocation2 + $0x44]] }
  0x73   :  { %v847_v26 = vpop.eup %846  ;;  %v464_v35 = vmul.f32 %v463_v24, %v1174_v17  ;;  %v466_v36 = vadd.f32 %v455_v19, %v450_v9  ;;  %v472_v38 = vmul.f32 %v446_v53, %v1107_v22  ;;  %v473_v39 = vmul.f32 %v448_v60, %v1111_v20 }
  0x74   :  { %351 = vst [vmem:[#allocation7 + $0x1] sm:$0x1] %v349_v31  ;;  %v395_v37 = vadd.f32 %v847_v26, %v843_v1  ;;  %v475_v42 = vmul.f32 %v451_v0, %v1115_v28  ;;  %850 = vtanh.f32 %v440_v27  ;;  %v476_v43 = vmul.f32 %v453_v11, %v1117_v30 }
  0x75   :  { %v465_v29 = vadd.f32 %v464_v35, %v462_v23  ;;  %v478_v41 = vmul.f32 %v456_v4, %v1132_v40  ;;  %v474_v45 = vadd.f32 %v473_v39, %v472_v38  ;;  %v479_v46 = vmul.f32 %v458_v13, %v1145_v48 }
  0x76   :  { %v396_v44 = vmul.f32 0.5, %v395_v37  ;;  %v481_v47 = vmul.f32 %v461_v16, %v1174_v17  ;;  %v477_v50 = vadd.f32 %v476_v43, %v475_v42  ;;  %v482_v51 = vmul.f32 %v463_v24, %v1186_v33 }
  0x77   :  { %v467_v49 = vadd.f32 %v465_v29, %v460_v34  ;;  %v493_v52 = vstv %s1274_s0  ;;  %v480_v55 = vadd.f32 %v479_v46, %v478_v41  ;;  %v495_v57 = vstv %s1280_s3  ;;  %s1415_s0 = sld [smem:[#allocation2 + $0x45]]  ;;  %s1418_s3 = sld [smem:[#allocation2 + $0x46]] }
  0x78   :  { %398 = vst [vmem:[#allocation7 + $0x2] sm:$0x1] %v396_v44  ;;  %v494_v53 = vmul.f32 %v493_v52, %v1099_v18  ;;  %v498_v58 = vstv %s1282_s4  ;;  %v483_v60 = vadd.f32 %v482_v51, %v481_v47  ;;  %v484_v56 = vadd.f32 %v477_v50, %v474_v45  ;;  %s1420_s4 = sld [smem:[#allocation2 + $0x47]] }
  0x79   :  { %v468_v59 = vadd.f32 %v467_v49, %v466_v36  ;;  %v496_v62 = vmul.f32 %v495_v57, %v1107_v22  ;;  %v499_v6 = vmul.f32 %v498_v58, %v1113_v25  ;;  %v500_v63 = vstv %s1286_s5  ;;  %s1426_s5 = sld [smem:[#allocation2 + $0x48]] }
  0x7a   :  { %v503_v0 = vstv %s1290_s6  ;;  %v505_v1 = vstv %s1292_s7  ;;  %v485_v3 = vadd.f32 %v483_v60, %v480_v55  ;;  %v501_v4 = vmul.f32 %v500_v63, %v1115_v28  ;;  %s1429_s6 = sld [smem:[#allocation2 + $0x49]]  ;;  %s1435_s7 = sld [smem:[#allocation2 + $0x4a]] }
  0x7b   :  { %v470_v2 = vadd.f32 %v469_v54, %v468_v59  ;;  %v497_v11 = vadd.f32 %v496_v62, %v494_v53  ;;  %v849_v8 = vpop.eup %848  ;;  %v504_v14 = vmul.f32 %v503_v0, %v1121_v32  ;;  %v506_v9 = vmul.f32 %v505_v1, %v1132_v40 }
  0x7c   :  { %v508_v12 = vstv %s1300_s8  ;;  %v510_v61 = vstv %s1302_s9  ;;  %v486_v7 = vadd.f32 %v485_v3, %v484_v56  ;;  %v502_v15 = vadd.f32 %v501_v4, %v499_v6  ;;  %s1438_s8 = sld [smem:[#allocation2 + $0x4b]] }
  0x7d   :  { %852 = vtanh.f32 %v470_v2  ;;  %v509_v13 = vmul.f32 %v508_v12, %v1167_v5  ;;  %v507_v16 = vadd.f32 %v506_v9, %v504_v14  ;;  %v511_v10 = vmul.f32 %v510_v61, %v1174_v17  ;;  %s1451_s9 = sld [smem:[#allocation2 + $0x53]] }
  0x7e   :  { %v516_v19 = vstv %s1308_s10  ;;  %v519_v21 = vmul.f32 %v493_v52, %v1107_v22  ;;  %v851_v23 = vpop.eup %850  ;;  %v487_v31 = vadd.f32 %v486_v7, %v469_v54  ;;  %v513_v24 = vadd.f32 %v502_v15, %v497_v11  ;;  %s936_s10 = smov [#allocation7]  }
  0x7f   :  { %v520_v26 = vmul.f32 %v495_v57, %v1111_v20  ;;  %v522_v27 = vmul.f32 %v498_v58, %v1115_v28  ;;  %v442_v34 = vadd.f32 %v851_v23, %v849_v8  ;;  %v512_v35 = vadd.f32 %v511_v10, %v509_v13 }
  0x80   :  { %v523_v36 = vmul.f32 %v500_v63, %v1117_v30  ;;  %v525_v37 = vmul.f32 %v503_v0, %v1132_v40  ;;  %854 = vtanh.f32 %v487_v31  ;;  %v526_v38 = vmul.f32 %v505_v1, %v1145_v48 }
  0x81   :  { %v521_v54 = vadd.f32 %v520_v26, %v519_v21  ;;  %v528_v39 = vmul.f32 %v508_v12, %v1174_v17  ;;  %v443_v42 = vmul.f32 0.5, %v442_v34  ;;  %v514_v29 = vadd.f32 %v512_v35, %v507_v16 }
  0x82   :  { %v524_v43 = vadd.f32 %v523_v36, %v522_v27  ;;  %v529_v41 = vmul.f32 %v510_v61, %v1186_v33  ;;  %v527_v44 = vadd.f32 %v526_v38, %v525_v37  ;;  %v540_v45 = vstv %s1320_s11  ;;  %s686_s11 = sshll.u32 %s936_s10, 4  ;;  %s687_s11 = int_to_ptr.vmem [resolvable:$true] %s686_s11 }
  0x83   :  { %v542_v46 = vstv %s1325_s1  ;;  %v545_v47 = vstv %s1327_s12  ;;  %445 = vst [vmem:[#allocation7 + $0x3] sm:$0x1] %v443_v42  ;;  %v515_v49 = vadd.f32 %v514_v29, %v513_v24  ;;  %v541_v52 = vmul.f32 %v540_v45, %v1099_v18  ;;  %s904_s1 = scalar_lea.vmem %s687_s11, 144  ;;  %s908_s12 = scalar_lea.vmem %s687_s11, 160 }
  0x84   :  { %v530_v50 = vadd.f32 %v529_v41, %v528_v39  ;;  %v531_v51 = vadd.f32 %v524_v43, %v521_v54  ;;  %v543_v55 = vmul.f32 %v542_v46, %v1107_v22  ;;  %v546_v53 = vmul.f32 %v545_v47, %v1113_v25  ;;  %p905_p11 = scmp.ne.s32.totalorder %s687_s11, %s904_s1  ;;  %p909_p12 = scmp.lt.s32.totalorder %s687_s11, %s687_s11 }
  0x85   :  { %v547_v57 = vstv %s1334_s13  ;;  %v550_v58 = vstv %s1336_s14  ;;  %v517_v59 = vadd.f32 %v516_v19, %v515_v49  ;;  %v552_v0 = vstv %s1341_s15  ;;  %p910_p13 = scmp.lt.s32.totalorder %s908_s12, %s904_s1 }
  0x86   :  { %v532_v60 = vadd.f32 %v530_v50, %v527_v44  ;;  %v548_v56 = vmul.f32 %v547_v57, %v1115_v28  ;;  %v551_v62 = vmul.f32 %v550_v58, %v1121_v32  ;;  %v544_v63 = vadd.f32 %v543_v55, %v541_v52 }
  0x87   :  { %v853_v6 = vpop.eup %852  ;;  %v555_v1 = vstv %s1347_s16  ;;  %v557_v2 = vstv %s1349_s17  ;;  %856 = vtanh.f32 %v517_v59  ;;  %v553_v4 = vmul.f32 %v552_v0, %v1132_v40  ;;  %p911_p0 = por %p910_p13, %p909_p12 }
  0x88   :  { %v533_v3 = vadd.f32 %v532_v60, %v531_v51  ;;  %v549_v11 = vadd.f32 %v548_v56, %v546_v53  ;;  %v556_v8 = vmul.f32 %v555_v1, %v1167_v5  ;;  %v558_v14 = vmul.f32 %v557_v2, %v1174_v17 }
  0x89   :  { %v563_v9 = vstv %s1355_s18  ;;  %v566_v12 = vmul.f32 %v540_v45, %v1107_v22  ;;  %v554_v7 = vadd.f32 %v553_v4, %v551_v62  ;;  %v567_v13 = vmul.f32 %v542_v46, %v1111_v20  ;;  %p912_p1 = pnand %p911_p0, %p905_p11 }
  0x8a   :  { %v534_v61 = vadd.f32 %v533_v3, %v516_v19  ;;  %v560_v15 = vadd.f32 %v549_v11, %v544_v63  ;;  %v855_v16 = vpop.eup %854  ;;  %v559_v10 = vadd.f32 %v558_v14, %v556_v8  ;;  %v569_v21 = vmul.f32 %v545_v47, %v1115_v28 }
  0x8b   :  { %v570_v23 = vmul.f32 %v547_v57, %v1117_v30  ;;  %v572_v31 = vmul.f32 %v550_v58, %v1132_v40  ;;  %v489_v24 = vadd.f32 %v855_v16, %v853_v6  ;;  %v568_v19 = vadd.f32 %v567_v13, %v566_v12 }
  0x8c   :  { %858 = vtanh.f32 %v534_v61  ;;  %v573_v26 = vmul.f32 %v552_v0, %v1145_v48  ;;  %v561_v27 = vadd.f32 %v559_v10, %v554_v7  ;;  %v575_v35 = vmul.f32 %v555_v1, %v1174_v17 }
  0x8d   :  { %v571_v34 = vadd.f32 %v570_v23, %v569_v21  ;;  %v576_v36 = vmul.f32 %v557_v2, %v1186_v33  ;;  %v490_v37 = vmul.f32 0.5, %v489_v24  ;;  %v587_v38 = vstv %s1368_s19 }
  0x8e   :  { %v574_v54 = vadd.f32 %v573_v26, %v572_v31  ;;  %v589_v39 = vstv %s1370_s20  ;;  %v562_v42 = vadd.f32 %v561_v27, %v560_v15  ;;  %v588_v41 = vmul.f32 %v587_v38, %v1099_v18 }
  0x8f   :  { %v577_v29 = vadd.f32 %v576_v36, %v575_v35  ;;  %v578_v43 = vadd.f32 %v571_v34, %v568_v19  ;;  %492 = vst [vmem:[#allocation7 + $0x4] sm:$0x1] %v490_v37  ;;  %v590_v44 = vmul.f32 %v589_v39, %v1107_v22  ;;  %v592_v45 = vstv %s1375_s21 }
  0x90   :  { %v594_v46 = vstv %s1378_s22  ;;  %v597_v47 = vstv %s1380_s23  ;;  %v564_v49 = vadd.f32 %v563_v9, %v562_v42  ;;  %v593_v51 = vmul.f32 %v592_v45, %v1113_v25 }
  0x91   :  { %v579_v50 = vadd.f32 %v577_v29, %v574_v54  ;;  %v595_v52 = vmul.f32 %v594_v46, %v1115_v28  ;;  %v857_v55 = vpop.eup %856  ;;  %v591_v53 = vadd.f32 %v590_v44, %v588_v41  ;;  %v598_v57 = vmul.f32 %v597_v47, %v1121_v32 }
  0x92   :  { %v599_v58 = vstv %s1387_s24  ;;  %v602_v59 = vstv %s1389_s25  ;;  %860 = vtanh.f32 %v564_v49  ;;  %v604_v63 = vstv %s1395_s26 }
  0x93   :  { %v580_v60 = vadd.f32 %v579_v50, %v578_v43  ;;  %v596_v56 = vadd.f32 %v595_v52, %v593_v51  ;;  %v600_v62 = vmul.f32 %v599_v58, %v1132_v40  ;;  %v603_v6 = vmul.f32 %v602_v59, %v1167_v5 }
  0x94   :  { %v610_v0 = vstv %s1397_s27  ;;  %v613_v1 = vmul.f32 %v587_v38, %v1107_v22  ;;  %v605_v11 = vmul.f32 %v604_v63, %v1174_v17  ;;  %v614_v14 = vmul.f32 %v589_v39, %v1111_v20 }
  0x95   :  { %v581_v2 = vadd.f32 %v580_v60, %v563_v9  ;;  %v601_v3 = vadd.f32 %v600_v62, %v598_v57  ;;  %v607_v4 = vadd.f32 %v596_v56, %v591_v53  ;;  %v616_v12 = vmul.f32 %v592_v45, %v1115_v28 }
  0x96   :  { %v859_v8 = vpop.eup %858  ;;  %v617_v61 = vmul.f32 %v594_v46, %v1117_v30  ;;  %v619_v7 = vmul.f32 %v597_v47, %v1132_v40  ;;  %v606_v9 = vadd.f32 %v605_v11, %v603_v6  ;;  %v620_v13 = vmul.f32 %v599_v58, %v1145_v48 }
  0x97   :  { %v536_v15 = vadd.f32 %v859_v8, %v857_v55  ;;  %862 = vtanh.f32 %v581_v2  ;;  %v615_v16 = vadd.f32 %v614_v14, %v613_v1  ;;  %v622_v21 = vmul.f32 %v602_v59, %v1174_v17 }
  0x98   :  { %v618_v10 = vadd.f32 %v617_v61, %v616_v12  ;;  %v623_v23 = vmul.f32 %v604_v63, %v1186_v33  ;;  %v608_v24 = vadd.f32 %v606_v9, %v601_v3  ;;  %v621_v19 = vadd.f32 %v620_v13, %v619_v7 }
  0x99   :  { %v537_v31 = vmul.f32 0.5, %v536_v15  ;;  %v634_v26 = vstv %s1410_s28  ;;  %v636_v36 = vstv %s1415_s0  ;;  %v639_v38 = vstv %s1418_s3 }
  0x9a   :  { %v624_v27 = vadd.f32 %v623_v23, %v622_v21  ;;  %v625_v34 = vadd.f32 %v618_v10, %v615_v16  ;;  %v635_v35 = vmul.f32 %v634_v26, %v1099_v18  ;;  %v609_v37 = vadd.f32 %v608_v24, %v607_v4 }
  0x9b   :  { %539 = vst [vmem:[#allocation7 + $0x5] sm:$0x1] %v537_v31  ;;  %v637_v54 = vmul.f32 %v636_v36, %v1107_v22  ;;  %v641_v39 = vstv %s1420_s4  ;;  %v640_v29 = vmul.f32 %v639_v38, %v1113_v25  ;;  %v644_v41 = vstv %s1426_s5 }
  0x9c   :  { %v626_v42 = vadd.f32 %v624_v27, %v621_v19  ;;  %v642_v43 = vmul.f32 %v641_v39, %v1115_v28  ;;  %v861_v44 = vpop.eup %860  ;;  %v611_v45 = vadd.f32 %v610_v0, %v609_v37  ;;  %v645_v46 = vmul.f32 %v644_v41, %v1121_v32 }
  0x9d   :  { %v638_v18 = vadd.f32 %v637_v54, %v635_v35  ;;  %v646_v47 = vstv %s1429_s6  ;;  %v649_v52 = vstv %s1435_s7  ;;  %v651_v25 = vstv %s1438_s8 }
  0x9e   :  { %v627_v49 = vadd.f32 %v626_v42, %v625_v34  ;;  %v643_v50 = vadd.f32 %v642_v43, %v640_v29  ;;  %v647_v51 = vmul.f32 %v646_v47, %v1132_v40  ;;  %864 = vtanh.f32 %v611_v45 }
  0x9f   :  { %v650_v55 = vmul.f32 %v649_v52, %v1167_v5  ;;  %v652_v58 = vmul.f32 %v651_v25, %v1174_v17  ;;  %v660_v56 = vmul.f32 %v634_v26, %v1107_v22  ;;  %v661_v32 = vmul.f32 %v636_v36, %v1111_v20 }
  0xa0   :  { %v628_v53 = vadd.f32 %v627_v49, %v610_v0  ;;  %v648_v57 = vadd.f32 %v647_v51, %v645_v46  ;;  %v654_v59 = vadd.f32 %v643_v50, %v638_v18  ;;  %v663_v62 = vmul.f32 %v639_v38, %v1115_v28 }
  0xa1   :  { %v863_v60 = vpop.eup %862  ;;  %v664_v6 = vmul.f32 %v641_v39, %v1117_v30  ;;  %v653_v1 = vadd.f32 %v652_v58, %v650_v55  ;;  %v666_v5 = vmul.f32 %v644_v41, %v1132_v40  ;;  %v662_v0 = vadd.f32 %v661_v32, %v660_v56 }
  0xa2   :  { %v583_v63 = vadd.f32 %v863_v60, %v861_v44  ;;  %866 = vtanh.f32 %v628_v53  ;;  %v667_v3 = vmul.f32 %v646_v47, %v1145_v48  ;;  %v669_v11 = vmul.f32 %v649_v52, %v1174_v17 }
  0xa3   :  { %v665_v2 = vadd.f32 %v664_v6, %v663_v62  ;;  %v655_v8 = vadd.f32 %v653_v1, %v648_v57  ;;  %v670_v22 = vmul.f32 %v651_v25, %v1186_v33  ;;  %v657_v20 = vstv %s1451_s9 }
  0xa4   :  { %v584_v4 = vmul.f32 0.5, %v583_v63  ;;  %v668_v14 = vadd.f32 %v667_v3, %v666_v5 }
  0xa5   :  { %v656_v28 = vadd.f32 %v655_v8, %v654_v59  ;;  %v671_v30 = vadd.f32 %v670_v22, %v669_v11  ;;  %v672_v12 = vadd.f32 %v665_v2, %v662_v0 }
  0xa6   :  { %586 = vst [vmem:[#allocation7 + $0x6] sm:$0x1] %v584_v4 }
  0xa7   :  { %v658_v61 = vadd.f32 %v657_v20, %v656_v28  ;;  %v673_v7 = vadd.f32 %v671_v30, %v668_v14 }
  0xa8   :  { %v865_v15 = vpop.eup %864 }
  0xa9   :  { %v674_v40 = vadd.f32 %v673_v7, %v672_v12  ;;  %868 = vtanh.f32 %v658_v61 }
  0xab   :  { %v675_v13 = vadd.f32 %v674_v40, %v657_v20 }
  0xac   :  { %v867_v9 = vpop.eup %866 }
  0xad   :  { %v630_v48 = vadd.f32 %v867_v9, %v865_v15  ;;  %870 = vtanh.f32 %v675_v13 }
  0xaf   :  { %v631_v17 = vmul.f32 0.5, %v630_v48 }
  0xb1   :  { %633 = vst [vmem:[#allocation7 + $0x7] sm:$0x1] %v631_v17 }
  0xb3   :  { %v869_v16 = vpop.eup %868 }
  0xb7   :  { %v871_v10 = vpop.eup %870 }
  0xb8   :  { %v677_v33 = vadd.f32 %v871_v10, %v869_v16 }
  0xba   :  { %v678_v21 = vmul.f32 0.5, %v677_v33 }
  0xbc   :  { %680 = vst [vmem:[#allocation7 + $0x8] sm:$0x1] %v678_v21 }
  0xbd   :  { %915 = shalt.err (!%p912_p1)
}
  0xbe   :  { %s916_s15 = scalar_lea.hbm %s1486_s2, 144 }
  0xbf   :  { %p917_p2 = scmp.ne.s32.totalorder %s1486_s2, %s916_s15  ;;  %p920_p3 = scmp.lt.u32.totalorder %s916_s15, %s1486_s2 }
  0xc1   :  { %p922_p4 = pnand %p920_p3, %p917_p2 }
  0xc3   :  { %925 = shalt.err (!%p922_p4)
}
  0xc4   :  { %692 = dma.vmem_to_hbm [thread:$0]  %s687_s11, 144, %s1486_s2, [#allocation4], %s934_s29, %s934_s29, %s935_s30  }
  0xc5   :  { %930 = dma.done.wait [#allocation4], 144  }
  0xc6   :  { %931 = vsyncadd [#allocation4], 4294967152 }
  0xc7   :  { %696 = vsyncpa [#allocation3], 1 }
  0xc8   :  { %697 = vsyncpa [#allocation4], 1 }
  0xc9   :  { %698 = vsyncpa [#allocation5], 1 }

</bundles_post_ra>
